<compile_context>
chip_gen: v7x
topology: tpu7x:2x2x1
jax: 0.10.0
libtpu: 0.0.40
codegen_flags: <defaults>
</compile_context>

<pallas_src>
import math
import jax
import jax.numpy as jnp
from jax import lax
from jax.experimental import pallas as pl
from jax.experimental.pallas import tpu as pltpu

LANE = 128  # pad every feature dim to the 128-lane width


def make_pinsage_kernel(dst_sizes):
    """Fused forward over all layers. dst_sizes are static per-layer dst counts."""
    n_layers = len(dst_sizes)

    def kernel(*refs):
        h_ref = refs[0]                         # [N0, LANE] f32 (zero-padded feats)
        a_refs = refs[1:1 + n_layers]           # [N_dst_l, N_src_l] bf16
        w_refs = refs[1 + n_layers:-1]          # 5 refs per layer
        out_ref = refs[-1]                      # [N_dst_last, LANE] f32

        h = h_ref[...]
        for l in range(n_layers):
            qwT = w_refs[5 * l][...]            # [LANE, LANE] bf16
            qb = w_refs[5 * l + 1][...]         # [1, LANE]    f32, last col = 1.0
            w1T = w_refs[5 * l + 2][...]        # [LANE, LANE] bf16 (acts on agg/ws)
            w2T = w_refs[5 * l + 3][...]        # [LANE, LANE] bf16 (acts on h_dst)
            wb = w_refs[5 * l + 4][...]         # [1, LANE]    f32
            a = a_refs[l][...]                  # [N_dst, N_src] bf16
            n_dst = dst_sizes[l]

            h_b = h.astype(jnp.bfloat16)
            # n = relu(Q h). qb's last padded column is 1.0, so n_src's last
            # column is all-ones -> the edge-weight sum rides the same MXU op.
            n_src = jnp.maximum(
                jnp.dot(h_b, qwT, preferred_element_type=jnp.float32) + qb, 0.0)

            # A @ [n | 1]: aggregation in the real columns, ws in column LANE-1.
            agg = jnp.dot(a, n_src.astype(jnp.bfloat16),
                          preferred_element_type=jnp.float32)
            ws = jnp.maximum(agg[:, LANE - 1:LANE], 1.0)        # clamp(min=1)
            rws = pl.reciprocal(ws, approx=True)                # EUP, not VPU div

            h_dst_b = h_b[:n_dst, :]                            # free static slice
            # z = relu(W(cat([agg/ws, h_dst], 1))) realized as two matmuls.
            # (agg*rws) col LANE-1 multiplies a zero row of w1T -> no effect.
            z = (jnp.dot((agg * rws).astype(jnp.bfloat16), w1T,
                         preferred_element_type=jnp.float32)
                 + jnp.dot(h_dst_b, w2T, preferred_element_type=jnp.float32)
                 + wb)
            z = jnp.maximum(z, 0.0)

            # row-wise L2 normalization with zero-norm protection (rsqrt on EUP)
            sumsq = jnp.sum(z * z, axis=1, keepdims=True)
            inv_norm = jnp.where(sumsq == 0.0, jnp.float32(1.0), lax.rsqrt(sumsq))
            h = z * inv_norm                                    # stays in VMEM

        out_ref[...] = h

    return kernel


def prep_layer_params(params):
    """Zero-pad one layer's params to LANE-wide slabs; bake the ones-column
    (MXU edge-weight sum) into the last column of the padded Q bias."""
    qwT, qb, w1T, w2T, wb = params
    d_in, hid = qwT.shape
    d_out = w1T.shape[1]
    assert d_in <= LANE and hid < LANE and d_out <= LANE
    qwT_p = jnp.pad(qwT, ((0, LANE - d_in), (0, LANE - hid))).astype(jnp.bfloat16)
    qb_p = jnp.pad(qb, ((0, 0), (0, LANE - hid))).at[0, LANE - 1].set(1.0)
    w1T_p = jnp.pad(w1T, ((0, LANE - hid), (0, LANE - d_out))).astype(jnp.bfloat16)
    w2T_p = jnp.pad(w2T, ((0, LANE - d_in), (0, LANE - d_out))).astype(jnp.bfloat16)
    wb_p = jnp.pad(wb, ((0, 0), (0, LANE - d_out)))
    return (qwT_p, qb_p, w1T_p, w2T_p, wb_p)


def pinsage_forward(adjs, h0, layer_params, n_classes):
    # TODO(synk): dropout is identity (eval mode); training-mode dropout omitted.
    n_layers = len(adjs)
    dst_sizes = tuple(int(a.shape[0]) for a in adjs)
    d_in = h0.shape[1]

    h0_p = jnp.pad(h0, ((0, 0), (0, LANE - d_in)))          # f32, lane-padded
    adjs_b = [a.astype(jnp.bfloat16) for a in adjs]
    flat_params = []
    for p in layer_params:
        flat_params.extend(prep_layer_params(p))

    # Advisory cost hint so XLA can schedule around the fused custom call.
    flops, transcendentals = 0, 0
    bytes_accessed = h0_p.size * 4 + dst_sizes[-1] * LANE * 4
    n_src = h0.shape[0]
    for l, nd in enumerate(dst_sizes):
        flops += 2 * (n_src * LANE * LANE        # Q matmul
                      + nd * n_src * LANE        # A @ [n | 1]
                      + 2 * nd * LANE * LANE)    # W matmul (two halves)
        transcendentals += 2 * nd                # reciprocal + rsqrt per dst row
        bytes_accessed += adjs_b[l].size * 2 + 3 * LANE * LANE * 2 + 2 * LANE * 4
        n_src = nd

    vmem = pl.BlockSpec(memory_space=pltpu.MemorySpace.VMEM)
    n_inputs = 1 + n_layers + 5 * n_layers
    out_pad = pl.pallas_call(
        make_pinsage_kernel(dst_sizes),
        out_shape=jax.ShapeDtypeStruct((dst_sizes[-1], LANE), jnp.float32),
        in_specs=[vmem] * n_inputs,
        out_specs=vmem,
        cost_estimate=pl.CostEstimate(flops=flops,
                                      transcendentals=transcendentals,
                                      bytes_accessed=bytes_accessed),
    )(h0_p, *adjs_b, *flat_params)
    return out_pad[:, :n_classes]


def xavier_uniform(key, out_dim, in_dim, gain):
    # PyTorch nn.Linear weight shape: (out_dim, in_dim)
    bound = gain * math.sqrt(6.0 / (in_dim + out_dim))
    return jax.random.uniform(key, (out_dim, in_dim), jnp.float32, -bound, bound)


def init_wsage_params(key, input_dims, hidden_dims, output_dims):
    gain = math.sqrt(2.0)  # nn.init.calculate_gain('relu')
    kq, kw = jax.random.split(key)
    q_w = xavier_uniform(kq, hidden_dims, input_dims, gain)                 # [H, D_in]
    w_w = xavier_uniform(kw, output_dims, input_dims + hidden_dims, gain)   # [D_out, H+D_in]
    qwT = q_w.T                                      # [D_in, H]
    qb = jnp.zeros((1, hidden_dims), jnp.float32)
    w1T = w_w[:, :hidden_dims].T                     # [H, D_out]   (acts on agg/ws)
    w2T = w_w[:, hidden_dims:].T                     # [D_in, D_out] (acts on h_dst)
    wb = jnp.zeros((1, output_dims), jnp.float32)
    return (qwT, qb, w1T, w2T, wb)


if __name__ == "__main__":
    key = jax.random.PRNGKey(0)

    in_feats, n_hidden, n_classes, n_layers = 16, 32, 8, 3
    src_sizes = [64, 32, 16]   # source node counts per block
    dst_sizes = [32, 16, 8]    # destination node counts per block

    k_params, k_feat, k_adj = jax.random.split(key, 3)
    layer_dims = [(in_feats, n_hidden, n_hidden)]
    for _ in range(1, n_layers - 1):
        layer_dims.append((n_hidden, n_hidden, n_hidden))
    layer_dims.append((n_hidden, n_hidden, n_classes))

    pkeys = jax.random.split(k_params, n_layers)
    layer_params = [init_wsage_params(pk, *dims)
                    for pk, dims in zip(pkeys, layer_dims)]

    # input node features
    h0 = jax.random.normal(k_feat, (src_sizes[0], in_feats), jnp.float32)

    # dense weighted adjacency per block (sparse-ish, nonnegative weights)
    adjs = []
    akeys = jax.random.split(k_adj, n_layers)
    for ak, nd, ns in zip(akeys, dst_sizes, src_sizes):
        kw_, km_ = jax.random.split(ak)
        w = jax.random.uniform(kw_, (nd, ns), jnp.float32, 0.1, 2.0)
        mask = (jax.random.uniform(km_, (nd, ns)) < 0.3).astype(jnp.float32)
        adjs.append(w * mask)

    out = pinsage_forward(adjs, h0, layer_params, n_classes)
    out = jax.block_until_ready(out)
    assert out.shape == (dst_sizes[-1], n_classes)
    assert bool(jnp.all(jnp.isfinite(out)))
    print("KERNEL_OK")
</pallas_src>

<mosaic_0001>
module attributes {stable_mosaic.version = 11 : i64} {
  func.func @kernel(%arg0: memref<64x128xf32, #tpu.memory_space<vmem>>, %arg1: memref<32x64xbf16, #tpu.memory_space<vmem>>, %arg2: memref<16x32xbf16, #tpu.memory_space<vmem>>, %arg3: memref<8x16xbf16, #tpu.memory_space<vmem>>, %arg4: memref<128x128xbf16, #tpu.memory_space<vmem>>, %arg5: memref<1x128xf32, #tpu.memory_space<vmem>>, %arg6: memref<128x128xbf16, #tpu.memory_space<vmem>>, %arg7: memref<128x128xbf16, #tpu.memory_space<vmem>>, %arg8: memref<1x128xf32, #tpu.memory_space<vmem>>, %arg9: memref<128x128xbf16, #tpu.memory_space<vmem>>, %arg10: memref<1x128xf32, #tpu.memory_space<vmem>>, %arg11: memref<128x128xbf16, #tpu.memory_space<vmem>>, %arg12: memref<128x128xbf16, #tpu.memory_space<vmem>>, %arg13: memref<1x128xf32, #tpu.memory_space<vmem>>, %arg14: memref<128x128xbf16, #tpu.memory_space<vmem>>, %arg15: memref<1x128xf32, #tpu.memory_space<vmem>>, %arg16: memref<128x128xbf16, #tpu.memory_space<vmem>>, %arg17: memref<128x128xbf16, #tpu.memory_space<vmem>>, %arg18: memref<1x128xf32, #tpu.memory_space<vmem>>, %arg19: memref<8x128xf32, #tpu.memory_space<vmem>>) attributes {dimension_semantics = [], scalar_prefetch = 0 : i64, scratch_operands = 0 : i64, tpu.core_type = #tpu.core_type<tc>} {
    %c0 = arith.constant 0 : index
    %c0_0 = arith.constant 0 : index
    %0 = vector.load %arg0[%c0, %c0_0] : memref<64x128xf32, #tpu.memory_space<vmem>>, vector<64x128xf32>
    %c0_1 = arith.constant 0 : index
    %c0_2 = arith.constant 0 : index
    %1 = vector.load %arg4[%c0_1, %c0_2] : memref<128x128xbf16, #tpu.memory_space<vmem>>, vector<128x128xbf16>
    %c0_3 = arith.constant 0 : index
    %c0_4 = arith.constant 0 : index
    %2 = vector.load %arg5[%c0_3, %c0_4] : memref<1x128xf32, #tpu.memory_space<vmem>>, vector<1x128xf32>
    %c0_5 = arith.constant 0 : index
    %c0_6 = arith.constant 0 : index
    %3 = vector.load %arg6[%c0_5, %c0_6] : memref<128x128xbf16, #tpu.memory_space<vmem>>, vector<128x128xbf16>
    %c0_7 = arith.constant 0 : index
    %c0_8 = arith.constant 0 : index
    %4 = vector.load %arg7[%c0_7, %c0_8] : memref<128x128xbf16, #tpu.memory_space<vmem>>, vector<128x128xbf16>
    %c0_9 = arith.constant 0 : index
    %c0_10 = arith.constant 0 : index
    %5 = vector.load %arg8[%c0_9, %c0_10] : memref<1x128xf32, #tpu.memory_space<vmem>>, vector<1x128xf32>
    %c0_11 = arith.constant 0 : index
    %c0_12 = arith.constant 0 : index
    %6 = vector.load %arg1[%c0_11, %c0_12] : memref<32x64xbf16, #tpu.memory_space<vmem>>, vector<32x64xbf16>
    %7 = arith.truncf %0 : vector<64x128xf32> to vector<64x128xbf16>
    %cst = arith.constant dense<0.000000e+00> : vector<64x128xf32>
    %8 = tpu.matmul %7, %1, %cst {dimension_numbers = #tpu.dot_dimension_numbers<[1], [0], [0], [1], [0, 0, 1, 1], [], []>} : vector<64x128xbf16>, vector<128x128xbf16>, vector<64x128xf32> -> vector<64x128xf32>
    %9 = vector.broadcast %2 : vector<1x128xf32> to vector<64x128xf32>
    %10 = arith.addf %8, %9 : vector<64x128xf32>
    %cst_13 = arith.constant 0.000000e+00 : f32
    %11 = vector.broadcast %cst_13 : f32 to vector<64x128xf32>
    %12 = arith.maximumf %10, %11 : vector<64x128xf32>
    %13 = arith.truncf %12 : vector<64x128xf32> to vector<64x128xbf16>
    %cst_14 = arith.constant dense<0.000000e+00> : vector<32x128xf32>
    %14 = tpu.matmul %6, %13, %cst_14 {dimension_numbers = #tpu.dot_dimension_numbers<[1], [0], [0], [1], [0, 0, 1, 1], [], []>} : vector<32x64xbf16>, vector<64x128xbf16>, vector<32x128xf32> -> vector<32x128xf32>
    %15 = vector.extract_strided_slice %14 {offsets = [0, 127], sizes = [32, 1], strides = [1, 1]} : vector<32x128xf32> to vector<32x1xf32>
    %cst_15 = arith.constant 1.000000e+00 : f32
    %16 = vector.broadcast %cst_15 : f32 to vector<32x1xf32>
    %17 = arith.maximumf %15, %16 : vector<32x1xf32>
    %18 = tpu.reciprocal %17 {approx = true} : vector<32x1xf32> -> vector<32x1xf32>
    %19 = vector.extract_strided_slice %7 {offsets = [0, 0], sizes = [32, 128], strides = [1, 1]} : vector<64x128xbf16> to vector<32x128xbf16>
    %20 = vector.broadcast %18 : vector<32x1xf32> to vector<32x128xf32>
    %21 = arith.mulf %14, %20 : vector<32x128xf32>
    %22 = arith.truncf %21 : vector<32x128xf32> to vector<32x128xbf16>
    %cst_16 = arith.constant dense<0.000000e+00> : vector<32x128xf32>
    %23 = tpu.matmul %22, %3, %cst_16 {dimension_numbers = #tpu.dot_dimension_numbers<[1], [0], [0], [1], [0, 0, 1, 1], [], []>} : vector<32x128xbf16>, vector<128x128xbf16>, vector<32x128xf32> -> vector<32x128xf32>
    %cst_17 = arith.constant dense<0.000000e+00> : vector<32x128xf32>
    %24 = tpu.matmul %19, %4, %cst_17 {dimension_numbers = #tpu.dot_dimension_numbers<[1], [0], [0], [1], [0, 0, 1, 1], [], []>} : vector<32x128xbf16>, vector<128x128xbf16>, vector<32x128xf32> -> vector<32x128xf32>
    %25 = arith.addf %23, %24 : vector<32x128xf32>
    %26 = vector.broadcast %5 : vector<1x128xf32> to vector<32x128xf32>
    %27 = arith.addf %25, %26 : vector<32x128xf32>
    %cst_18 = arith.constant 0.000000e+00 : f32
    %28 = vector.broadcast %cst_18 : f32 to vector<32x128xf32>
    %29 = arith.maximumf %27, %28 : vector<32x128xf32>
    %30 = arith.mulf %29, %29 : vector<32x128xf32>
    %cst_19 = arith.constant dense<0.000000e+00> : vector<32xf32>
    %31 = vector.multi_reduction <add>, %30, %cst_19 [1] : vector<32x128xf32> to vector<32xf32>
    %32 = vector.shape_cast %31 : vector<32xf32> to vector<32x1xf32>
    %cst_20 = arith.constant 0.000000e+00 : f32
    %33 = vector.broadcast %cst_20 : f32 to vector<32x1xf32>
    %34 = arith.cmpf oeq, %32, %33 : vector<32x1xf32>
    %35 = math.rsqrt %32 : vector<32x1xf32>
    %cst_21 = arith.constant 1.000000e+00 : f32
    %36 = vector.broadcast %cst_21 : f32 to vector<32x1xf32>
    %37 = arith.select %34, %36, %35 : vector<32x1xi1>, vector<32x1xf32>
    %38 = vector.broadcast %37 : vector<32x1xf32> to vector<32x128xf32>
    %39 = arith.mulf %29, %38 : vector<32x128xf32>
    %c0_22 = arith.constant 0 : index
    %c0_23 = arith.constant 0 : index
    %40 = vector.load %arg9[%c0_22, %c0_23] : memref<128x128xbf16, #tpu.memory_space<vmem>>, vector<128x128xbf16>
    %c0_24 = arith.constant 0 : index
    %c0_25 = arith.constant 0 : index
    %41 = vector.load %arg10[%c0_24, %c0_25] : memref<1x128xf32, #tpu.memory_space<vmem>>, vector<1x128xf32>
    %c0_26 = arith.constant 0 : index
    %c0_27 = arith.constant 0 : index
    %42 = vector.load %arg11[%c0_26, %c0_27] : memref<128x128xbf16, #tpu.memory_space<vmem>>, vector<128x128xbf16>
    %c0_28 = arith.constant 0 : index
    %c0_29 = arith.constant 0 : index
    %43 = vector.load %arg12[%c0_28, %c0_29] : memref<128x128xbf16, #tpu.memory_space<vmem>>, vector<128x128xbf16>
    %c0_30 = arith.constant 0 : index
    %c0_31 = arith.constant 0 : index
    %44 = vector.load %arg13[%c0_30, %c0_31] : memref<1x128xf32, #tpu.memory_space<vmem>>, vector<1x128xf32>
    %c0_32 = arith.constant 0 : index
    %c0_33 = arith.constant 0 : index
    %45 = vector.load %arg2[%c0_32, %c0_33] : memref<16x32xbf16, #tpu.memory_space<vmem>>, vector<16x32xbf16>
    %46 = arith.truncf %39 : vector<32x128xf32> to vector<32x128xbf16>
    %cst_34 = arith.constant dense<0.000000e+00> : vector<32x128xf32>
    %47 = tpu.matmul %46, %40, %cst_34 {dimension_numbers = #tpu.dot_dimension_numbers<[1], [0], [0], [1], [0, 0, 1, 1], [], []>} : vector<32x128xbf16>, vector<128x128xbf16>, vector<32x128xf32> -> vector<32x128xf32>
    %48 = vector.broadcast %41 : vector<1x128xf32> to vector<32x128xf32>
    %49 = arith.addf %47, %48 : vector<32x128xf32>
    %cst_35 = arith.constant 0.000000e+00 : f32
    %50 = vector.broadcast %cst_35 : f32 to vector<32x128xf32>
    %51 = arith.maximumf %49, %50 : vector<32x128xf32>
    %52 = arith.truncf %51 : vector<32x128xf32> to vector<32x128xbf16>
    %cst_36 = arith.constant dense<0.000000e+00> : vector<16x128xf32>
    %53 = tpu.matmul %45, %52, %cst_36 {dimension_numbers = #tpu.dot_dimension_numbers<[1], [0], [0], [1], [0, 0, 1, 1], [], []>} : vector<16x32xbf16>, vector<32x128xbf16>, vector<16x128xf32> -> vector<16x128xf32>
    %54 = vector.extract_strided_slice %53 {offsets = [0, 127], sizes = [16, 1], strides = [1, 1]} : vector<16x128xf32> to vector<16x1xf32>
    %cst_37 = arith.constant 1.000000e+00 : f32
    %55 = vector.broadcast %cst_37 : f32 to vector<16x1xf32>
    %56 = arith.maximumf %54, %55 : vector<16x1xf32>
    %57 = tpu.reciprocal %56 {approx = true} : vector<16x1xf32> -> vector<16x1xf32>
    %58 = vector.extract_strided_slice %46 {offsets = [0, 0], sizes = [16, 128], strides = [1, 1]} : vector<32x128xbf16> to vector<16x128xbf16>
    %59 = vector.broadcast %57 : vector<16x1xf32> to vector<16x128xf32>
    %60 = arith.mulf %53, %59 : vector<16x128xf32>
    %61 = arith.truncf %60 : vector<16x128xf32> to vector<16x128xbf16>
    %cst_38 = arith.constant dense<0.000000e+00> : vector<16x128xf32>
    %62 = tpu.matmul %61, %42, %cst_38 {dimension_numbers = #tpu.dot_dimension_numbers<[1], [0], [0], [1], [0, 0, 1, 1], [], []>} : vector<16x128xbf16>, vector<128x128xbf16>, vector<16x128xf32> -> vector<16x128xf32>
    %cst_39 = arith.constant dense<0.000000e+00> : vector<16x128xf32>
    %63 = tpu.matmul %58, %43, %cst_39 {dimension_numbers = #tpu.dot_dimension_numbers<[1], [0], [0], [1], [0, 0, 1, 1], [], []>} : vector<16x128xbf16>, vector<128x128xbf16>, vector<16x128xf32> -> vector<16x128xf32>
    %64 = arith.addf %62, %63 : vector<16x128xf32>
    %65 = vector.broadcast %44 : vector<1x128xf32> to vector<16x128xf32>
    %66 = arith.addf %64, %65 : vector<16x128xf32>
    %cst_40 = arith.constant 0.000000e+00 : f32
    %67 = vector.broadcast %cst_40 : f32 to vector<16x128xf32>
    %68 = arith.maximumf %66, %67 : vector<16x128xf32>
    %69 = arith.mulf %68, %68 : vector<16x128xf32>
    %cst_41 = arith.constant dense<0.000000e+00> : vector<16xf32>
    %70 = vector.multi_reduction <add>, %69, %cst_41 [1] : vector<16x128xf32> to vector<16xf32>
    %71 = vector.shape_cast %70 : vector<16xf32> to vector<16x1xf32>
    %cst_42 = arith.constant 0.000000e+00 : f32
    %72 = vector.broadcast %cst_42 : f32 to vector<16x1xf32>
    %73 = arith.cmpf oeq, %71, %72 : vector<16x1xf32>
    %74 = math.rsqrt %71 : vector<16x1xf32>
    %cst_43 = arith.constant 1.000000e+00 : f32
    %75 = vector.broadcast %cst_43 : f32 to vector<16x1xf32>
    %76 = arith.select %73, %75, %74 : vector<16x1xi1>, vector<16x1xf32>
    %77 = vector.broadcast %76 : vector<16x1xf32> to vector<16x128xf32>
    %78 = arith.mulf %68, %77 : vector<16x128xf32>
    %c0_44 = arith.constant 0 : index
    %c0_45 = arith.constant 0 : index
    %79 = vector.load %arg14[%c0_44, %c0_45] : memref<128x128xbf16, #tpu.memory_space<vmem>>, vector<128x128xbf16>
    %c0_46 = arith.constant 0 : index
    %c0_47 = arith.constant 0 : index
    %80 = vector.load %arg15[%c0_46, %c0_47] : memref<1x128xf32, #tpu.memory_space<vmem>>, vector<1x128xf32>
    %c0_48 = arith.constant 0 : index
    %c0_49 = arith.constant 0 : index
    %81 = vector.load %arg16[%c0_48, %c0_49] : memref<128x128xbf16, #tpu.memory_space<vmem>>, vector<128x128xbf16>
    %c0_50 = arith.constant 0 : index
    %c0_51 = arith.constant 0 : index
    %82 = vector.load %arg17[%c0_50, %c0_51] : memref<128x128xbf16, #tpu.memory_space<vmem>>, vector<128x128xbf16>
    %c0_52 = arith.constant 0 : index
    %c0_53 = arith.constant 0 : index
    %83 = vector.load %arg18[%c0_52, %c0_53] : memref<1x128xf32, #tpu.memory_space<vmem>>, vector<1x128xf32>
    %c0_54 = arith.constant 0 : index
    %c0_55 = arith.constant 0 : index
    %84 = vector.load %arg3[%c0_54, %c0_55] : memref<8x16xbf16, #tpu.memory_space<vmem>>, vector<8x16xbf16>
    %85 = arith.truncf %78 : vector<16x128xf32> to vector<16x128xbf16>
    %cst_56 = arith.constant dense<0.000000e+00> : vector<16x128xf32>
    %86 = tpu.matmul %85, %79, %cst_56 {dimension_numbers = #tpu.dot_dimension_numbers<[1], [0], [0], [1], [0, 0, 1, 1], [], []>} : vector<16x128xbf16>, vector<128x128xbf16>, vector<16x128xf32> -> vector<16x128xf32>
    %87 = vector.broadcast %80 : vector<1x128xf32> to vector<16x128xf32>
    %88 = arith.addf %86, %87 : vector<16x128xf32>
    %cst_57 = arith.constant 0.000000e+00 : f32
    %89 = vector.broadcast %cst_57 : f32 to vector<16x128xf32>
    %90 = arith.maximumf %88, %89 : vector<16x128xf32>
    %91 = arith.truncf %90 : vector<16x128xf32> to vector<16x128xbf16>
    %cst_58 = arith.constant dense<0.000000e+00> : vector<8x128xf32>
    %92 = tpu.matmul %84, %91, %cst_58 {dimension_numbers = #tpu.dot_dimension_numbers<[1], [0], [0], [1], [0, 0, 1, 1], [], []>} : vector<8x16xbf16>, vector<16x128xbf16>, vector<8x128xf32> -> vector<8x128xf32>
    %93 = vector.extract_strided_slice %92 {offsets = [0, 127], sizes = [8, 1], strides = [1, 1]} : vector<8x128xf32> to vector<8x1xf32>
    %cst_59 = arith.constant 1.000000e+00 : f32
    %94 = vector.broadcast %cst_59 : f32 to vector<8x1xf32>
    %95 = arith.maximumf %93, %94 : vector<8x1xf32>
    %96 = tpu.reciprocal %95 {approx = true} : vector<8x1xf32> -> vector<8x1xf32>
    %97 = vector.extract_strided_slice %85 {offsets = [0, 0], sizes = [8, 128], strides = [1, 1]} : vector<16x128xbf16> to vector<8x128xbf16>
    %98 = vector.broadcast %96 : vector<8x1xf32> to vector<8x128xf32>
    %99 = arith.mulf %92, %98 : vector<8x128xf32>
    %100 = arith.truncf %99 : vector<8x128xf32> to vector<8x128xbf16>
    %cst_60 = arith.constant dense<0.000000e+00> : vector<8x128xf32>
    %101 = tpu.matmul %100, %81, %cst_60 {dimension_numbers = #tpu.dot_dimension_numbers<[1], [0], [0], [1], [0, 0, 1, 1], [], []>} : vector<8x128xbf16>, vector<128x128xbf16>, vector<8x128xf32> -> vector<8x128xf32>
    %cst_61 = arith.constant dense<0.000000e+00> : vector<8x128xf32>
    %102 = tpu.matmul %97, %82, %cst_61 {dimension_numbers = #tpu.dot_dimension_numbers<[1], [0], [0], [1], [0, 0, 1, 1], [], []>} : vector<8x128xbf16>, vector<128x128xbf16>, vector<8x128xf32> -> vector<8x128xf32>
    %103 = arith.addf %101, %102 : vector<8x128xf32>
    %104 = vector.broadcast %83 : vector<1x128xf32> to vector<8x128xf32>
    %105 = arith.addf %103, %104 : vector<8x128xf32>
    %cst_62 = arith.constant 0.000000e+00 : f32
    %106 = vector.broadcast %cst_62 : f32 to vector<8x128xf32>
    %107 = arith.maximumf %105, %106 : vector<8x128xf32>
    %108 = arith.mulf %107, %107 : vector<8x128xf32>
    %cst_63 = arith.constant dense<0.000000e+00> : vector<8xf32>
    %109 = vector.multi_reduction <add>, %108, %cst_63 [1] : vector<8x128xf32> to vector<8xf32>
    %110 = vector.shape_cast %109 : vector<8xf32> to vector<8x1xf32>
    %cst_64 = arith.constant 0.000000e+00 : f32
    %111 = vector.broadcast %cst_64 : f32 to vector<8x1xf32>
    %112 = arith.cmpf oeq, %110, %111 : vector<8x1xf32>
    %113 = math.rsqrt %110 : vector<8x1xf32>
    %cst_65 = arith.constant 1.000000e+00 : f32
    %114 = vector.broadcast %cst_65 : f32 to vector<8x1xf32>
    %115 = arith.select %112, %114, %113 : vector<8x1xi1>, vector<8x1xf32>
    %116 = vector.broadcast %115 : vector<8x1xf32> to vector<8x128xf32>
    %117 = arith.mulf %107, %116 : vector<8x128xf32>
    %c0_66 = arith.constant 0 : index
    %c0_67 = arith.constant 0 : index
    %118 = vector.load %arg19[%c0_66, %c0_67] : memref<8x128xf32, #tpu.memory_space<vmem>>, vector<8x128xf32>
    tpu.vector_store %arg19[%c0_66, %c0_67], %117 {strides = array<i32>} : memref<8x128xf32, #tpu.memory_space<vmem>>, vector<8x128xf32>,
    return
  }
}

</mosaic_0001>

<bundles_post_ra>
// kernel: tpu_custom_call.1
= control target key start
LH: loop header
LB: loop body
LE: loop exit
PB: predicated region body
PF: predicated region fallthrough
CT: control target
= control target key end

     0   :  { %s3076_s0 = inlined_call_operand.hbm [shape: f32[64,128], index: 0, kind: input, shape index: {}]   ;;  %s3077_s1 = inlined_call_operand.hbm [shape: bf16[32,64], index: 1, kind: input, shape index: {}]   ;;  %s3078_s2 = inlined_call_operand.hbm [shape: bf16[16,32], index: 2, kind: input, shape index: {}]   ;;  %s3079_s3 = inlined_call_operand.hbm [shape: bf16[8,16], index: 3, kind: input, shape index: {}]   ;;  %s3080_s4 = inlined_call_operand.hbm [shape: bf16[128,128], index: 4, kind: input, shape index: {}]   ;;  %s3081_s5 = inlined_call_operand.hbm [shape: f32[1,128], index: 5, kind: input, shape index: {}]   ;;  %s3082_s6 = inlined_call_operand.hbm [shape: bf16[128,128], index: 6, kind: input, shape index: {}]   ;;  %s3083_s7 = inlined_call_operand.hbm [shape: bf16[128,128], index: 7, kind: input, shape index: {}]   ;;  %s3084_s8 = inlined_call_operand.hbm [shape: f32[1,128], index: 8, kind: input, shape index: {}]   ;;  %s3085_s9 = inlined_call_operand.hbm [shape: bf16[128,128], index: 9, kind: input, shape index: {}]   ;;  %s3086_s10 = inlined_call_operand.hbm [shape: f32[1,128], index: 10, kind: input, shape index: {}]   ;;  %s3087_s11 = inlined_call_operand.hbm [shape: bf16[128,128], index: 11, kind: input, shape index: {}]   ;;  %s3088_s12 = inlined_call_operand.hbm [shape: bf16[128,128], index: 12, kind: input, shape index: {}]   ;;  %s3089_s13 = inlined_call_operand.hbm [shape: f32[1,128], index: 13, kind: input, shape index: {}]   ;;  %s3090_s14 = inlined_call_operand.hbm [shape: bf16[128,128], index: 14, kind: input, shape index: {}]   ;;  %s3091_s15 = inlined_call_operand.hbm [shape: f32[1,128], index: 15, kind: input, shape index: {}]   ;;  %s3092_s16 = inlined_call_operand.hbm [shape: bf16[128,128], index: 16, kind: input, shape index: {}]   ;;  %s3093_s17 = inlined_call_operand.vmem [shape: bf16[128,128], index: 17, kind: input, shape index: {}]   ;;  %s3094_s18 = inlined_call_operand.vmem [shape: f32[1,128], index: 18, kind: input, shape index: {}]   ;;  %s3095_s19 = inlined_call_operand.hbm [shape: f32[8,128], index: 19, kind: output, shape index: {}]  }
   0x1   :  { %3102 = sst [smem:[#allocation40_spill]] %s3076_s0 }
   0x2   :  { %3103 = sst [smem:[#allocation41_spill]] %s3077_s1 }
   0x3   :  { %3104 = sst [smem:[#allocation42_spill]] %s3078_s2 }
   0x4   :  { %3105 = sst [smem:[#allocation43_spill]] %s3079_s3 }
   0x5   :  { %3106 = sst [smem:[#allocation44_spill]] %s3093_s17 }
   0x6   :  { %3107 = sst [smem:[#allocation45_spill]] %s3094_s18 }
   0x7   :  { %3108 = sst [smem:[#allocation46_spill]] %s3095_s19 }
   0x8   :  { %24 = vsyncpa [#allocation3], 0 }
   0x9   :  { %25 = vsyncpa [#allocation6], 0 }
   0xa   :  { %26 = vsyncpa [#allocation9], 0 }
   0xb   :  { %27 = vsyncpa [#allocation12], 0 }
   0xc   :  { %28 = vsyncpa [#allocation15], 0 }
   0xd   :  { %29 = vsyncpa [#allocation18], 0 }
   0xe   :  { %30 = vsyncpa [#allocation21], 0 }
   0xf   :  { %31 = vsyncpa [#allocation24], 0 }
  0x10   :  { %32 = vsyncpa [#allocation27], 0 }
  0x11   :  { %33 = vsyncpa [#allocation4], 0  ;;  %s2608_s0 = smov [#allocation5]   ;;  %s3109_s1 = sld [smem:[#allocation41_spill]] }
  0x12   :  { %s51_s30 = sshll.u32 %s2608_s0, 4  ;;  %s52_s30 = int_to_ptr.vmem [resolvable:$true] %s51_s30 }
  0x17   :  { %s2192_s22 = scalar_lea.hbm %s3109_s1, 256 }
  0x18   :  { %p2193_p0 = scmp.ne.s32.totalorder %s3109_s1, %s2192_s22  ;;  %p2196_p1 = scmp.lt.u32.totalorder %s2192_s22, %s3109_s1 }
  0x1a   :  { %p2198_p2 = pnand %p2196_p1, %p2193_p0 }
  0x1c   :  { %2201 = shalt.err (!%p2198_p2)
}
  0x1d   :  { %s2202_s3 = scalar_lea.vmem %s52_s30, 256  ;;  %p2207_p4 = scmp.lt.s32.totalorder %s52_s30, %s52_s30 }
  0x1e   :  { %p2203_p3 = scmp.ne.s32.totalorder %s52_s30, %s2202_s3  ;;  %p2208_p5 = scmp.lt.s32.totalorder %s2202_s3, %s2202_s3 }
  0x20   :  { %p2209_p6 = por %p2208_p5, %p2207_p4 }
  0x22   :  { %p2210_p7 = pnand %p2209_p6, %p2203_p3 }
  0x24   :  { %2213 = shalt.err (!%p2210_p7)
}
  0x25   :  { %s2609_s26 = smov 64   ;;  %s2610_s27 = smov 4  }
  0x26   :  { %57 = dma.hbm_to_vmem [thread:$0]  %s3109_s1, 256, %s52_s30, [#allocation6], %s2609_s26, %s2609_s26, %s2610_s27  }
  0x27   :  { %s2611_s0 = smov [#allocation8]   ;;  %s2612_s21 = smov [#allocation11]  }
  0x28   :  { %s76_s20 = sshll.u32 %s2611_s0, 4  ;;  %s98_s22 = sshll.u32 %s2612_s21, 4  ;;  %s77_s20 = int_to_ptr.vmem [resolvable:$true] %s76_s20  ;;  %s99_s22 = int_to_ptr.vmem [resolvable:$true] %s98_s22 }
  0x29   :  { %s3110_s24 = sld [smem:[#allocation43_spill]] }
  0x2f   :  { %s2214_s25 = scalar_lea.hbm %s3110_s24, 64 }
  0x30   :  { %p2215_p8 = scmp.ne.s32.totalorder %s3110_s24, %s2214_s25  ;;  %p2218_p9 = scmp.lt.u32.totalorder %s2214_s25, %s3110_s24 }
  0x32   :  { %p2220_p10 = pnand %p2218_p9, %p2215_p8 }
  0x34   :  { %2223 = shalt.err (!%p2220_p10)
}
  0x35   :  { %s2224_s30 = scalar_lea.vmem %s77_s20, 64  ;;  %p2229_p12 = scmp.lt.s32.totalorder %s77_s20, %s77_s20 }
  0x36   :  { %p2225_p11 = scmp.ne.s32.totalorder %s77_s20, %s2224_s30  ;;  %p2230_p13 = scmp.lt.s32.totalorder %s2224_s30, %s2224_s30 }
  0x38   :  { %p2231_p0 = por %p2230_p13, %p2229_p12 }
  0x3a   :  { %p2232_p1 = pnand %p2231_p0, %p2225_p11 }
  0x3c   :  { %2235 = shalt.err (!%p2232_p1)
}
  0x3d   :  { %79 = dma.hbm_to_vmem [thread:$0]  %s3110_s24, 64, %s77_s20, [#allocation9]  }
  0x3e   :  { %s2236_s0 = scalar_lea.hbm %s3081_s5, 16 }
  0x3f   :  { %p2237_p2 = scmp.ne.s32.totalorder %s3081_s5, %s2236_s0  ;;  %p2240_p3 = scmp.lt.u32.totalorder %s2236_s0, %s3081_s5 }
  0x41   :  { %p2242_p4 = pnand %p2240_p3, %p2237_p2 }
  0x43   :  { %2245 = shalt.err (!%p2242_p4)
}
  0x44   :  { %s2246_s23 = scalar_lea.vmem %s99_s22, 16  ;;  %s2250_s25 = scalar_lea.vmem %s99_s22, 32 }
  0x45   :  { %p2247_p5 = scmp.ne.s32.totalorder %s99_s22, %s2246_s23  ;;  %p2251_p6 = scmp.lt.s32.totalorder %s99_s22, %s99_s22 }
  0x46   :  { %p2252_p7 = scmp.lt.s32.totalorder %s2250_s25, %s2246_s23 }
  0x48   :  { %p2253_p8 = por %p2252_p7, %p2251_p6 }
  0x4a   :  { %p2254_p9 = pnand %p2253_p8, %p2247_p5 }
  0x4c   :  { %2257 = shalt.err (!%p2254_p9)
}
  0x4d   :  { %101 = dma.hbm_to_vmem [thread:$0]  %s3081_s5, 16, %s99_s22, [#allocation12]  }
  0x4e   :  { %s2613_s3 = smov [#allocation14]   ;;  %s2614_s1 = smov [#allocation17]  }
  0x4f   :  { %s119_s30 = sshll.u32 %s2613_s3, 4  ;;  %s141_s28 = sshll.u32 %s2614_s1, 4  ;;  %s120_s30 = int_to_ptr.vmem [resolvable:$true] %s119_s30  ;;  %s142_s28 = int_to_ptr.vmem [resolvable:$true] %s141_s28 }
  0x50   :  { %s2258_s0 = scalar_lea.hbm %s3083_s7, 1024 }
  0x51   :  { %p2259_p10 = scmp.ne.s32.totalorder %s3083_s7, %s2258_s0  ;;  %p2262_p11 = scmp.lt.u32.totalorder %s2258_s0, %s3083_s7 }
  0x53   :  { %p2264_p12 = pnand %p2262_p11, %p2259_p10 }
  0x55   :  { %2267 = shalt.err (!%p2264_p12)
}
  0x56   :  { %s2268_s5 = scalar_lea.vmem %s120_s30, 1024  ;;  %p2273_p0 = scmp.lt.s32.totalorder %s120_s30, %s120_s30 }
  0x57   :  { %p2269_p13 = scmp.ne.s32.totalorder %s120_s30, %s2268_s5  ;;  %p2274_p1 = scmp.lt.s32.totalorder %s2268_s5, %s2268_s5 }
  0x59   :  { %p2275_p2 = por %p2274_p1, %p2273_p0 }
  0x5b   :  { %p2276_p3 = pnand %p2275_p2, %p2269_p13 }
  0x5d   :  { %2279 = shalt.err (!%p2276_p3)
}
  0x5e   :  { %125 = dma.hbm_to_vmem [thread:$0]  %s3083_s7, 1024, %s120_s30, [#allocation15], %s2609_s26, %s2609_s26, %s2610_s27  }
  0x5f   :  { %s2280_s24 = scalar_lea.hbm %s3085_s9, 1024 }
  0x60   :  { %p2281_p4 = scmp.ne.s32.totalorder %s3085_s9, %s2280_s24  ;;  %p2284_p5 = scmp.lt.u32.totalorder %s2280_s24, %s3085_s9 }
  0x62   :  { %p2286_p6 = pnand %p2284_p5, %p2281_p4 }
  0x64   :  { %2289 = shalt.err (!%p2286_p6)
}
  0x65   :  { %s2290_s0 = scalar_lea.vmem %s142_s28, 1024  ;;  %p2295_p8 = scmp.lt.s32.totalorder %s142_s28, %s142_s28 }
  0x66   :  { %p2291_p7 = scmp.ne.s32.totalorder %s142_s28, %s2290_s0  ;;  %p2296_p9 = scmp.lt.s32.totalorder %s2290_s0, %s2290_s0 }
  0x68   :  { %p2297_p10 = por %p2296_p9, %p2295_p8 }
  0x6a   :  { %p2298_p11 = pnand %p2297_p10, %p2291_p7 }
  0x6c   :  { %2301 = shalt.err (!%p2298_p11)
}
  0x6d   :  { %147 = dma.hbm_to_vmem [thread:$0]  %s3085_s9, 1024, %s142_s28, [#allocation18], %s2609_s26, %s2609_s26, %s2610_s27  }
  0x6e   :  { %s2615_s17 = smov [#allocation20]   ;;  %s2616_s21 = smov [#allocation23]  }
  0x6f   :  { %s163_s18 = sshll.u32 %s2615_s17, 4  ;;  %s188_s2 = sshll.u32 %s2616_s21, 4  ;;  %s164_s18 = int_to_ptr.vmem [resolvable:$true] %s163_s18  ;;  %s189_s2 = int_to_ptr.vmem [resolvable:$true] %s188_s2 }
  0x70   :  { %s2302_s23 = scalar_lea.hbm %s3087_s11, 1024 }
  0x71   :  { %p2303_p12 = scmp.ne.s32.totalorder %s3087_s11, %s2302_s23  ;;  %p2306_p13 = scmp.lt.u32.totalorder %s2302_s23, %s3087_s11 }
  0x73   :  { %p2308_p0 = pnand %p2306_p13, %p2303_p12 }
  0x75   :  { %2311 = shalt.err (!%p2308_p0)
}
  0x76   :  { %s2312_s9 = scalar_lea.vmem %s164_s18, 1024  ;;  %p2317_p2 = scmp.lt.s32.totalorder %s164_s18, %s164_s18 }
  0x77   :  { %p2313_p1 = scmp.ne.s32.totalorder %s164_s18, %s2312_s9  ;;  %p2318_p3 = scmp.lt.s32.totalorder %s2312_s9, %s2312_s9 }
  0x79   :  { %p2319_p4 = por %p2318_p3, %p2317_p2 }
  0x7b   :  { %p2320_p5 = pnand %p2319_p4, %p2313_p1 }
  0x7d   :  { %2323 = shalt.err (!%p2320_p5)
}
  0x7e   :  { %169 = dma.hbm_to_vmem [thread:$0]  %s3087_s11, 1024, %s164_s18, [#allocation21], %s2609_s26, %s2609_s26, %s2610_s27  }
  0x7f   :  { %s2324_s0 = scalar_lea.hbm %s3089_s13, 16 }
  0x80   :  { %p2325_p6 = scmp.ne.s32.totalorder %s3089_s13, %s2324_s0  ;;  %p2328_p7 = scmp.lt.u32.totalorder %s2324_s0, %s3089_s13 }
  0x82   :  { %p2330_p8 = pnand %p2328_p7, %p2325_p6 }
  0x84   :  { %2333 = shalt.err (!%p2330_p8)
}
  0x85   :  { %s2334_s5 = scalar_lea.vmem %s189_s2, 16  ;;  %s2338_s22 = scalar_lea.vmem %s189_s2, 32 }
  0x86   :  { %p2335_p9 = scmp.ne.s32.totalorder %s189_s2, %s2334_s5  ;;  %p2339_p10 = scmp.lt.s32.totalorder %s189_s2, %s189_s2 }
  0x87   :  { %p2340_p11 = scmp.lt.s32.totalorder %s2338_s22, %s2334_s5 }
  0x89   :  { %p2341_p12 = por %p2340_p11, %p2339_p10 }
  0x8b   :  { %p2342_p13 = pnand %p2341_p12, %p2335_p9 }
  0x8d   :  { %2345 = shalt.err (!%p2342_p13)
}
  0x8e   :  { %191 = dma.hbm_to_vmem [thread:$0]  %s3089_s13, 16, %s189_s2, [#allocation24]  }
  0x8f   :  { %s2617_s23 = smov [#allocation26]   ;;  %s2618_s20 = smov [#allocation2]  }
  0x90   :  { %s210_s25 = sshll.u32 %s2617_s23, 4  ;;  %s39_s24 = sshll.u32 %s2618_s20, 4  ;;  %s211_s25 = int_to_ptr.vmem [resolvable:$true] %s210_s25  ;;  %s40_s24 = int_to_ptr.vmem [resolvable:$true] %s39_s24 }
  0x91   :  { %s2346_s28 = scalar_lea.hbm %s3091_s15, 16 }
  0x92   :  { %p2347_p0 = scmp.ne.s32.totalorder %s3091_s15, %s2346_s28  ;;  %p2350_p1 = scmp.lt.u32.totalorder %s2346_s28, %s3091_s15 }
  0x94   :  { %p2352_p2 = pnand %p2350_p1, %p2347_p0 }
  0x96   :  { %2355 = shalt.err (!%p2352_p2)
}
  0x97   :  { %s2356_s13 = scalar_lea.vmem %s211_s25, 16  ;;  %s2360_s2 = scalar_lea.vmem %s211_s25, 32 }
  0x98   :  { %p2357_p3 = scmp.ne.s32.totalorder %s211_s25, %s2356_s13  ;;  %p2361_p4 = scmp.lt.s32.totalorder %s211_s25, %s211_s25 }
  0x99   :  { %p2362_p5 = scmp.lt.s32.totalorder %s2360_s2, %s2356_s13 }
  0x9b   :  { %p2363_p6 = por %p2362_p5, %p2361_p4 }
  0x9d   :  { %p2364_p7 = pnand %p2363_p6, %p2357_p3 }
  0x9f   :  { %2367 = shalt.err (!%p2364_p7)
}
  0xa0   :  { %213 = dma.hbm_to_vmem [thread:$0]  %s3091_s15, 16, %s211_s25, [#allocation27]  }
  0xa1   :  { %s3111_s5 = sld [smem:[#allocation40_spill]] }
  0xa7   :  { %s2368_s22 = scalar_lea.hbm %s3111_s5, 1024 }
  0xa8   :  { %p2369_p8 = scmp.ne.s32.totalorder %s3111_s5, %s2368_s22  ;;  %p2372_p9 = scmp.lt.u32.totalorder %s2368_s22, %s3111_s5 }
  0xaa   :  { %p2374_p10 = pnand %p2372_p9, %p2369_p8 }
  0xac   :  { %2377 = shalt.err (!%p2374_p10)
}
  0xad   :  { %s2378_s3 = scalar_lea.vmem %s40_s24, 1024  ;;  %p2383_p12 = scmp.lt.s32.totalorder %s40_s24, %s40_s24 }
  0xae   :  { %p2379_p11 = scmp.ne.s32.totalorder %s40_s24, %s2378_s3  ;;  %p2384_p13 = scmp.lt.s32.totalorder %s2378_s3, %s2378_s3 }
  0xb0   :  { %p2385_p0 = por %p2384_p13, %p2383_p12 }
  0xb2   :  { %p2386_p1 = pnand %p2385_p0, %p2379_p11 }
  0xb4   :  { %2389 = shalt.err (!%p2386_p1)
}
  0xb5   :  { %s2619_s15 = smov 128   ;;  %s2620_s25 = smov 8  }
  0xb6   :  { %45 = dma.hbm_to_vmem [thread:$0]  %s3111_s5, 1024, %s40_s24, [#allocation3], %s2619_s15, %s2619_s15, %s2620_s25  }
  0xb7   :  { %s2621_s1 = smov [#allocation7]   ;;  %s2622_s29 = smov [#allocation10]  }
  0xb8   :  { %s63_s19 = sshll.u32 %s2621_s1, 4  ;;  %s85_s0 = sshll.u32 %s2622_s29, 4  ;;  %s64_s19 = int_to_ptr.vmem [resolvable:$true] %s63_s19  ;;  %s86_s0 = int_to_ptr.vmem [resolvable:$true] %s85_s0 }
  0xb9   :  { %s3112_s7 = sld [smem:[#allocation42_spill]] }
  0xbf   :  { %s2390_s30 = scalar_lea.hbm %s3112_s7, 128 }
  0xc0   :  { %p2391_p2 = scmp.ne.s32.totalorder %s3112_s7, %s2390_s30  ;;  %p2394_p3 = scmp.lt.u32.totalorder %s2390_s30, %s3112_s7 }
  0xc2   :  { %p2396_p4 = pnand %p2394_p3, %p2391_p2 }
  0xc4   :  { %2399 = shalt.err (!%p2396_p4)
}
  0xc5   :  { %s2400_s24 = scalar_lea.vmem %s64_s19, 128  ;;  %p2405_p6 = scmp.lt.s32.totalorder %s64_s19, %s64_s19 }
  0xc6   :  { %p2401_p5 = scmp.ne.s32.totalorder %s64_s19, %s2400_s24  ;;  %p2406_p7 = scmp.lt.s32.totalorder %s2400_s24, %s2400_s24 }
  0xc8   :  { %p2407_p8 = por %p2406_p7, %p2405_p6 }
  0xca   :  { %p2408_p9 = pnand %p2407_p8, %p2401_p5 }
  0xcc   :  { %2411 = shalt.err (!%p2408_p9)
}
  0xcd   :  { %69 = dma.hbm_to_vmem [thread:$0]  %s3112_s7, 128, %s64_s19, [#allocation6], %s2609_s26, %s2609_s26, %s2610_s27  }
  0xce   :  { %s2412_s3 = scalar_lea.hbm %s3080_s4, 1024 }
  0xcf   :  { %p2413_p10 = scmp.ne.s32.totalorder %s3080_s4, %s2412_s3  ;;  %p2416_p11 = scmp.lt.u32.totalorder %s2412_s3, %s3080_s4 }
  0xd1   :  { %p2418_p12 = pnand %p2416_p11, %p2413_p10 }
  0xd3   :  { %2421 = shalt.err (!%p2418_p12)
}
  0xd4   :  { %s2422_s1 = scalar_lea.vmem %s86_s0, 1024  ;;  %p2427_p0 = scmp.lt.s32.totalorder %s86_s0, %s86_s0 }
  0xd5   :  { %p2423_p13 = scmp.ne.s32.totalorder %s86_s0, %s2422_s1  ;;  %p2428_p1 = scmp.lt.s32.totalorder %s2422_s1, %s2422_s1 }
  0xd7   :  { %p2429_p2 = por %p2428_p1, %p2427_p0 }
  0xd9   :  { %p2430_p3 = pnand %p2429_p2, %p2423_p13 }
  0xdb   :  { %2433 = shalt.err (!%p2430_p3)
}
  0xdc   :  { %91 = dma.hbm_to_vmem [thread:$0]  %s3080_s4, 1024, %s86_s0, [#allocation9], %s2609_s26, %s2609_s26, %s2610_s27  }
  0xdd   :  { %s2623_s13 = smov [#allocation13]   ;;  %s2624_s7 = smov [#allocation16]  }
  0xde   :  { %s107_s2 = sshll.u32 %s2623_s13, 4  ;;  %s132_s30 = sshll.u32 %s2624_s7, 4  ;;  %s108_s2 = int_to_ptr.vmem [resolvable:$true] %s107_s2  ;;  %s133_s30 = int_to_ptr.vmem [resolvable:$true] %s132_s30 }
  0xdf   :  { %s2434_s22 = scalar_lea.hbm %s3082_s6, 1024 }
  0xe0   :  { %p2435_p4 = scmp.ne.s32.totalorder %s3082_s6, %s2434_s22  ;;  %p2438_p5 = scmp.lt.u32.totalorder %s2434_s22, %s3082_s6 }
  0xe2   :  { %p2440_p6 = pnand %p2438_p5, %p2435_p4 }
  0xe4   :  { %2443 = shalt.err (!%p2440_p6)
}
  0xe5   :  { %s2444_s4 = scalar_lea.vmem %s108_s2, 1024  ;;  %p2449_p8 = scmp.lt.s32.totalorder %s108_s2, %s108_s2 }
  0xe6   :  { %p2445_p7 = scmp.ne.s32.totalorder %s108_s2, %s2444_s4  ;;  %p2450_p9 = scmp.lt.s32.totalorder %s2444_s4, %s2444_s4 }
  0xe8   :  { %p2451_p10 = por %p2450_p9, %p2449_p8 }
  0xea   :  { %p2452_p11 = pnand %p2451_p10, %p2445_p7 }
  0xec   :  { %2455 = shalt.err (!%p2452_p11)
}
  0xed   :  { %113 = dma.hbm_to_vmem [thread:$0]  %s3082_s6, 1024, %s108_s2, [#allocation12], %s2609_s26, %s2609_s26, %s2610_s27  }
  0xee   :  { %s2456_s15 = scalar_lea.hbm %s3084_s8, 16 }
  0xef   :  { %p2457_p12 = scmp.ne.s32.totalorder %s3084_s8, %s2456_s15  ;;  %p2460_p13 = scmp.lt.u32.totalorder %s2456_s15, %s3084_s8 }
  0xf1   :  { %p2462_p0 = pnand %p2460_p13, %p2457_p12 }
  0xf3   :  { %2465 = shalt.err (!%p2462_p0)
}
  0xf4   :  { %s2466_s19 = scalar_lea.vmem %s133_s30, 16  ;;  %s2470_s29 = scalar_lea.vmem %s133_s30, 32 }
  0xf5   :  { %p2467_p1 = scmp.ne.s32.totalorder %s133_s30, %s2466_s19  ;;  %p2471_p2 = scmp.lt.s32.totalorder %s133_s30, %s133_s30 }
  0xf6   :  { %p2472_p3 = scmp.lt.s32.totalorder %s2470_s29, %s2466_s19 }
  0xf8   :  { %p2473_p4 = por %p2472_p3, %p2471_p2 }
  0xfa   :  { %p2474_p5 = pnand %p2473_p4, %p2467_p1 }
  0xfc   :  { %2477 = shalt.err (!%p2474_p5)
}
  0xfd   :  { %135 = dma.hbm_to_vmem [thread:$0]  %s3084_s8, 16, %s133_s30, [#allocation15]  }
  0xfe   :  { %s2625_s2 = smov [#allocation19]   ;;  %s2626_s17 = smov [#allocation22]  }
  0xff   :  { %s154_s7 = sshll.u32 %s2625_s2, 4  ;;  %s175_s21 = sshll.u32 %s2626_s17, 4  ;;  %s155_s7 = int_to_ptr.vmem [resolvable:$true] %s154_s7  ;;  %s176_s21 = int_to_ptr.vmem [resolvable:$true] %s175_s21 }
 0x100   :  { %s2478_s24 = scalar_lea.hbm %s3086_s10, 16 }
 0x101   :  { %p2479_p6 = scmp.ne.s32.totalorder %s3086_s10, %s2478_s24  ;;  %p2482_p7 = scmp.lt.u32.totalorder %s2478_s24, %s3086_s10 }
 0x103   :  { %p2484_p8 = pnand %p2482_p7, %p2479_p6 }
 0x105   :  { %2487 = shalt.err (!%p2484_p8)
}
 0x106   :  { %s2488_s8 = scalar_lea.vmem %s155_s7, 16  ;;  %s2492_s30 = scalar_lea.vmem %s155_s7, 32 }
 0x107   :  { %p2489_p9 = scmp.ne.s32.totalorder %s155_s7, %s2488_s8  ;;  %p2493_p10 = scmp.lt.s32.totalorder %s155_s7, %s155_s7 }
 0x108   :  { %p2494_p11 = scmp.lt.s32.totalorder %s2492_s30, %s2488_s8 }
 0x10a   :  { %p2495_p12 = por %p2494_p11, %p2493_p10 }
 0x10c   :  { %p2496_p13 = pnand %p2495_p12, %p2489_p9 }
 0x10e   :  { %2499 = shalt.err (!%p2496_p13)
}
 0x10f   :  { %157 = dma.hbm_to_vmem [thread:$0]  %s3086_s10, 16, %s155_s7, [#allocation18]  }
 0x110   :  { %s2500_s25 = scalar_lea.hbm %s3088_s12, 1024 }
 0x111   :  { %p2501_p0 = scmp.ne.s32.totalorder %s3088_s12, %s2500_s25  ;;  %p2504_p1 = scmp.lt.u32.totalorder %s2500_s25, %s3088_s12 }
 0x113   :  { %p2506_p2 = pnand %p2504_p1, %p2501_p0 }
 0x115   :  { %2509 = shalt.err (!%p2506_p2)
}
 0x116   :  { %s2510_s29 = scalar_lea.vmem %s176_s21, 1024  ;;  %p2515_p4 = scmp.lt.s32.totalorder %s176_s21, %s176_s21 }
 0x117   :  { %p2511_p3 = scmp.ne.s32.totalorder %s176_s21, %s2510_s29  ;;  %p2516_p5 = scmp.lt.s32.totalorder %s2510_s29, %s2510_s29 }
 0x119   :  { %p2517_p6 = por %p2516_p5, %p2515_p4 }
 0x11b   :  { %p2518_p7 = pnand %p2517_p6, %p2511_p3 }
 0x11d   :  { %2521 = shalt.err (!%p2518_p7)
}
 0x11e   :  { %181 = dma.hbm_to_vmem [thread:$0]  %s3088_s12, 1024, %s176_s21, [#allocation21], %s2609_s26, %s2609_s26, %s2610_s27  }
 0x11f   :  { %s2627_s13 = smov [#allocation25]   ;;  %s2628_s7 = smov [#allocation28]  }
 0x120   :  { %s197_s2 = sshll.u32 %s2627_s13, 4  ;;  %s219_s17 = sshll.u32 %s2628_s7, 4  ;;  %s198_s2 = int_to_ptr.vmem [resolvable:$true] %s197_s2  ;;  %s220_s17 = int_to_ptr.vmem [resolvable:$true] %s219_s17 }
 0x121   :  { %s2522_s24 = scalar_lea.hbm %s3090_s14, 1024 }
 0x122   :  { %p2523_p8 = scmp.ne.s32.totalorder %s3090_s14, %s2522_s24  ;;  %p2526_p9 = scmp.lt.u32.totalorder %s2522_s24, %s3090_s14 }
 0x124   :  { %p2528_p10 = pnand %p2526_p9, %p2523_p8 }
 0x126   :  { %2531 = shalt.err (!%p2528_p10)
}
 0x127   :  { %s2532_s12 = scalar_lea.vmem %s198_s2, 1024  ;;  %p2537_p12 = scmp.lt.s32.totalorder %s198_s2, %s198_s2 }
 0x128   :  { %p2533_p11 = scmp.ne.s32.totalorder %s198_s2, %s2532_s12  ;;  %p2538_p13 = scmp.lt.s32.totalorder %s2532_s12, %s2532_s12 }
 0x12a   :  { %p2539_p0 = por %p2538_p13, %p2537_p12 }
 0x12c   :  { %p2540_p1 = pnand %p2539_p0, %p2533_p11 }
 0x12e   :  { %2543 = shalt.err (!%p2540_p1)
}
 0x12f   :  { %203 = dma.hbm_to_vmem [thread:$0]  %s3090_s14, 1024, %s198_s2, [#allocation24], %s2609_s26, %s2609_s26, %s2610_s27  }
 0x130   :  { %s2544_s20 = scalar_lea.hbm %s3092_s16, 1024 }
 0x131   :  { %p2545_p2 = scmp.ne.s32.totalorder %s3092_s16, %s2544_s20  ;;  %p2548_p3 = scmp.lt.u32.totalorder %s2544_s20, %s3092_s16 }
 0x133   :  { %p2550_p4 = pnand %p2548_p3, %p2545_p2 }
 0x135   :  { %2553 = shalt.err (!%p2550_p4)
}
 0x136   :  { %s2554_s28 = scalar_lea.vmem %s220_s17, 1024  ;;  %p2559_p6 = scmp.lt.s32.totalorder %s220_s17, %s220_s17 }
 0x137   :  { %p2555_p5 = scmp.ne.s32.totalorder %s220_s17, %s2554_s28  ;;  %p2560_p7 = scmp.lt.s32.totalorder %s2554_s28, %s2554_s28 }
 0x139   :  { %p2561_p8 = por %p2560_p7, %p2559_p6 }
 0x13b   :  { %p2562_p9 = pnand %p2561_p8, %p2555_p5 }
 0x13d   :  { %2565 = shalt.err (!%p2562_p9)
}
 0x13e   :  { %225 = dma.hbm_to_vmem [thread:$0]  %s3092_s16, 1024, %s220_s17, [#allocation27], %s2609_s26, %s2609_s26, %s2610_s27  }
 0x13f   :  { %2588 = dma.done.wait [#allocation3], 1024  }
 0x140   :  { %2589 = vsyncadd [#allocation3], 4294966272 }
 0x141   :  { %2590 = dma.done.wait [#allocation6], 384  }
 0x142   :  { %2591 = vsyncadd [#allocation6], 4294966912 }
 0x143   :  { %2592 = dma.done.wait [#allocation9], 1088  }
 0x144   :  { %2593 = vsyncadd [#allocation9], 4294966208 }
 0x145   :  { %2594 = dma.done.wait [#allocation12], 1040  }
 0x146   :  { %2595 = vsyncadd [#allocation12], 4294966256 }
 0x147   :  { %2596 = dma.done.wait [#allocation15], 1040  }
 0x148   :  { %2597 = vsyncadd [#allocation15], 4294966256 }
 0x149   :  { %2598 = dma.done.wait [#allocation18], 1040  }
 0x14a   :  { %2599 = vsyncadd [#allocation18], 4294966256 }
 0x14b   :  { %2600 = dma.done.wait [#allocation21], 2048  }
 0x14c   :  { %2601 = vsyncadd [#allocation21], 4294965248 }
 0x14d   :  { %2602 = dma.done.wait [#allocation24], 1040  }
 0x14e   :  { %2603 = vsyncadd [#allocation24], 4294966256 }
 0x14f   :  { %2604 = dma.done.wait [#allocation27], 1040  }
 0x150   :  { %2605 = vsyncadd [#allocation27], 4294966256  ;;  %v2089_v0 = vld [vmem:[#allocation10] sm:$0xff]   ;;  %v2090_v1 = vld [vmem:[#allocation10 + $0x8] sm:$0xff]   ;;  %vm489_vm0 = vcmask 523264   ;;  %v2629_v51 = vmov 127  }
 0x151   :  { %1848 = vmatprep.subr.bf16.mxu0 %v2089_v0  ;;  %v2091_v2 = vld [vmem:[#allocation10 + $0x10] sm:$0xff]   ;;  %v2092_v3 = vld [vmem:[#allocation10 + $0x18] sm:$0xff]   ;;  %v282_v4 = vld [vmem:[#allocation2] sm:$0xff]  ;;  %2088 = vset.pattern.permute.xlu1 %v2629_v51  ;;  %vm2631_vm1 = vmmov 0   ;;  %vm983_vm6 = vcmask 261120   ;;  %vm1397_vm9 = vcmask 130048  }
 0x152   :  { %1849 = vmatpush3.bf16.msra.mxu0 %v2089_v0  ;;  %v283_v5 = vld [vmem:[#allocation2 + $0x8] sm:$0xff]  ;;  %v2093_v7 = vld [vmem:[#allocation10 + $0x20] sm:$0xff]   ;;  %v2096_v10 = vld [vmem:[#allocation10 + $0x38] sm:$0xff]   ;;  %2087 = vset.pattern.permute.xlu0 %v2629_v51  ;;  %v2630_v51 = vmov 0.0   ;;  %s3113_s27 = sld [smem:[#allocation44_spill]]  ;;  %s3114_s21 = sld [smem:[#allocation45_spill]] }
 0x153   :  { %1850 = vmatprep.subr.bf16.mxu0 %v2090_v1  ;;  %v2967_v6 = vpack.c.bf16 %v283_v5, %v282_v4  ;;  %v2094_v8 = vld [vmem:[#allocation10 + $0x28] sm:$0xff]   ;;  %v2095_v9 = vld [vmem:[#allocation10 + $0x30] sm:$0xff]   ;;  %v285_v12 = vld [vmem:[#allocation2 + $0x18] sm:$0xff]  ;;  %s2632_s8 = smov [#allocation29]  }
 0x154   :  { %v284_v11 = vld [vmem:[#allocation2 + $0x10] sm:$0xff]  ;;  %v286_v13 = vld [vmem:[#allocation2 + $0x20] sm:$0xff]  ;;  %v287_v14 = vld [vmem:[#allocation2 + $0x28] sm:$0xff]  ;;  %s1648_s30 = sshll.u32 %s2632_s8, 4  ;;  %s1649_s30 = int_to_ptr.vmem [resolvable:$true] %s1648_s30 }
 0x155   :  { %1864 = vmatprep.mubr.bf16.mxu0 %v2967_v6  ;;  %v2970_v15 = vpack.c.bf16 %v285_v12, %v284_v11  ;;  %v346_v16 = vpack.c.bf16 %v287_v14, %v286_v13  ;;  %v288_v17 = vld [vmem:[#allocation2 + $0x30] sm:$0xff]  ;;  %v289_v18 = vld [vmem:[#allocation2 + $0x38] sm:$0xff]  ;;  %v2097_v20 = vld [vmem:[#allocation5] sm:$0xff]   ;;  %s2566_s23 = scalar_lea.vmem %s1649_s30, 128  ;;  %p2571_p11 = scmp.lt.s32.totalorder %s1649_s30, %s1649_s30 }
 0x156   :  { %1851 = vmatpush3.bf16.msra.mxu0 %v2090_v1  ;;  %v347_v19 = vpack.c.bf16 %v289_v18, %v288_v17  ;;  %1880 = vmatprep.mubr.msk.bf16.mxu1 %vm489_vm0, %v2097_v20  ;;  %v1665_v21 = vld [vmem:[#allocation11] ss:$0 sm:$0xff]  ;;  %v2098_v50 = vld [vmem:[#allocation5 + $0x8] sm:$0xff]   ;;  %v2099_v52 = vld [vmem:[#allocation14] sm:$0xff]   ;;  %p2567_p10 = scmp.ne.s32.totalorder %s1649_s30, %s2566_s23  ;;  %p2572_p12 = scmp.lt.s32.totalorder %s2566_s23, %s2566_s23 }
 0x157   :  { %1852 = vmatprep.subr.bf16.mxu0 %v2091_v2  ;;  %v2100_v53 = vld [vmem:[#allocation14 + $0x8] sm:$0xff]   ;;  %v2101_v54 = vld [vmem:[#allocation14 + $0x10] sm:$0xff]   ;;  %v2102_v55 = vld [vmem:[#allocation14 + $0x18] sm:$0xff]  }
 0x158   :  { %v2103_v56 = vld [vmem:[#allocation14 + $0x20] sm:$0xff]   ;;  %v2104_v57 = vld [vmem:[#allocation14 + $0x28] sm:$0xff]   ;;  %v2105_v58 = vld [vmem:[#allocation14 + $0x30] sm:$0xff]   ;;  %p2573_p13 = por %p2572_p12, %p2571_p11 }
 0x159   :  { %v2106_v59 = vld [vmem:[#allocation14 + $0x38] sm:$0xff]   ;;  %v2107_v60 = vld [vmem:[#allocation13] sm:$0xff]   ;;  %v2108_v61 = vld [vmem:[#allocation13 + $0x8] sm:$0xff]  }
 0x15a   :  { %1853 = vmatpush3.bf16.msra.mxu0 %v2091_v2  ;;  %v2109_v62 = vld [vmem:[#allocation13 + $0x10] sm:$0xff]   ;;  %v2110_v63 = vld [vmem:[#allocation13 + $0x18] sm:$0xff]   ;;  %v2111_v0 = vld [vmem:[#allocation13 + $0x20] sm:$0xff]   ;;  %p2574_p0 = pnand %p2573_p13, %p2567_p10 }
 0x15b   :  { %1854 = vmatprep.subr.bf16.mxu0 %v2092_v3  ;;  %v2112_v1 = vld [vmem:[#allocation13 + $0x28] sm:$0xff]   ;;  %v2113_v12 = vld [vmem:[#allocation13 + $0x30] sm:$0xff]  }
 0x15e   :  { %1855 = vmatpush3.bf16.msra.mxu0 %v2092_v3 }
 0x15f   :  { %1856 = vmatprep.subr.bf16.mxu0 %v2093_v7 }
 0x162   :  { %1857 = vmatpush3.bf16.msra.mxu0 %v2093_v7 }
 0x163   :  { %1858 = vmatprep.subr.bf16.mxu0 %v2094_v8 }
 0x166   :  { %1859 = vmatpush3.bf16.msra.mxu0 %v2094_v8 }
 0x167   :  { %1860 = vmatprep.subr.bf16.mxu0 %v2095_v9 }
 0x16a   :  { %1861 = vmatpush3.bf16.msra.mxu0 %v2095_v9 }
 0x16b   :  { %1862 = vmatprep.subr.bf16.mxu0 %v2096_v10 }
 0x16e   :  { %1863 = vmatpush3.bf16.msra.mxu0 %v2096_v10 }
 0x171   :  { %1865 = vmatmul.mubr.bf16.vlgmr.msra.gmra.mrb[0].mxu0 %v2970_v15 }
 0x172   :  { %1868 = vmatprep.mubr.bf16.mxu0 %v346_v16 }
 0x179   :  { %1869 = vmatmul.mubr.bf16.gmra.mrb[4].mxu0 %v347_v19 }
 0x244   :  { %v1866_v22 = vpop.f32.mrb[0].mxu0 }
 0x245   :  { %v445_v23 = vadd.f32 %v1866_v22, %v1665_v21  ;;  %v436_v24 = vpop.f32.mrb[1].mxu0 }
 0x246   :  { %v437_v25 = vadd.f32 %v1665_v21, %v436_v24  ;;  %v1867_v26 = vpop.f32.mrb[2].mxu0 }
 0x247   :  { %v448_v27 = vadd.f32 %v1867_v26, %v1665_v21  ;;  %v439_v28 = vpop.f32.mrb[3].mxu0  ;;  %v469_v30 = vmax.f32 %v445_v23, 0.0  ;;  %v2115_v26 = vld [vmem:[#allocation17] sm:$0xff]  }
 0x248   :  { %v440_v29 = vadd.f32 %v1665_v21, %v439_v28  ;;  %v467_v32 = vmax.f32 %v437_v25, 0.0  ;;  %1924 = vmatprep.subr.bf16.mxu0 %v2115_v26  ;;  %v2117_v28 = vld [vmem:[#allocation17 + $0x10] sm:$0xff]  }
 0x249   :  { %v470_v31 = vmax.f32 %v448_v27, 0.0  ;;  %v2116_v27 = vld [vmem:[#allocation17 + $0x8] sm:$0xff]   ;;  %1925 = vmatpush3.bf16.msra.mxu0 %v2115_v26 }
 0x24a   :  { %v468_v33 = vmax.f32 %v440_v29, 0.0  ;;  %1926 = vmatprep.subr.bf16.mxu0 %v2116_v27  ;;  %v1694_v29 = vld [vmem:[#allocation16] ss:$0 sm:$0xff] }
 0x24b   :  { %v476_v34 = vpack.c.bf16 %v470_v31, %v469_v30 }
 0x24c   :  { %v1870_v35 = vpop.f32.mrb[4].mxu0  ;;  %v475_v36 = vpack.c.bf16 %v468_v33, %v467_v32 }
 0x24d   :  { %v461_v37 = vadd.f32 %v1870_v35, %v1665_v21  ;;  %v452_v38 = vpop.f32.mrb[5].mxu0  ;;  %1927 = vmatpush3.bf16.msra.mxu0 %v2116_v27 }
 0x24e   :  { %v453_v39 = vadd.f32 %v1665_v21, %v452_v38  ;;  %v1871_v40 = vpop.f32.mrb[6].mxu0  ;;  %1872 = vmatprep.subr.bf16.mxu1 %v475_v36  ;;  %1928 = vmatprep.subr.bf16.mxu0 %v2117_v28 }
 0x24f   :  { %v464_v41 = vadd.f32 %v1871_v40, %v1665_v21  ;;  %v455_v42 = vpop.f32.mrb[7].mxu0  ;;  %1873 = vmatpush3.bf16.msra.mxu1 %v475_v36  ;;  %v473_v44 = vmax.f32 %v461_v37, 0.0 }
 0x250   :  { %v456_v43 = vadd.f32 %v1665_v21, %v455_v42  ;;  %1874 = vmatprep.subr.bf16.mxu1 %v476_v34  ;;  %v471_v46 = vmax.f32 %v453_v39, 0.0 }
 0x251   :  { %v474_v45 = vmax.f32 %v464_v41, 0.0  ;;  %1929 = vmatpush3.bf16.msra.mxu0 %v2117_v28 }
 0x252   :  { %v472_v47 = vmax.f32 %v456_v43, 0.0 }
 0x253   :  { %v478_v48 = vpack.c.bf16 %v474_v45, %v473_v44  ;;  %1875 = vmatpush3.bf16.msra.mxu1 %v476_v34 }
 0x254   :  { %v477_v49 = vpack.c.bf16 %v472_v47, %v471_v46  ;;  %v2118_v46 = vld [vmem:[#allocation17 + $0x18] sm:$0xff]   ;;  %v2119_v47 = vld [vmem:[#allocation17 + $0x20] sm:$0xff]  }
 0x255   :  { %1930 = vmatprep.subr.bf16.mxu0 %v2118_v46 }
 0x256   :  { %1876 = vmatprep.subr.bf16.mxu1 %v477_v49  ;;  %1931 = vmatpush3.bf16.msra.mxu0 %v2118_v46 }
 0x257   :  { %1877 = vmatpush3.bf16.msra.mxu1 %v477_v49  ;;  %1932 = vmatprep.subr.bf16.mxu0 %v2119_v47  ;;  %v2121_v49 = vld [vmem:[#allocation17 + $0x30] sm:$0xff]  }
 0x258   :  { %1878 = vmatprep.subr.bf16.mxu1 %v478_v48 }
 0x25a   :  { %1933 = vmatpush3.bf16.msra.mxu0 %v2119_v47 }
 0x25b   :  { %1879 = vmatpush3.bf16.msra.mxu1 %v478_v48  ;;  %v2120_v48 = vld [vmem:[#allocation17 + $0x28] sm:$0xff]  }
 0x25c   :  { %1884 = vmatprep.subr.bf16.mxu1 %v2099_v52  ;;  %1934 = vmatprep.subr.bf16.mxu0 %v2120_v48 }
 0x25e   :  { %1881 = vmatmul.mubr.msk.bf16.vlgmr.msra.gmra.mrb[0].mxu1 %vm489_vm0, %v2098_v50  ;;  %1935 = vmatpush3.bf16.msra.mxu0 %v2120_v48  ;;  %v2122_v50 = vld [vmem:[#allocation17 + $0x38] sm:$0xff]  }
 0x25f   :  { %1900 = vmatprep.mubr.bf16.mxu1 %v2967_v6  ;;  %1885 = vmatpush3.bf16.msra.mxu1 %v2099_v52 }
 0x260   :  { %1886 = vmatprep.subr.bf16.mxu1 %v2100_v53  ;;  %1936 = vmatprep.subr.bf16.mxu0 %v2121_v49 }
 0x262   :  { %1937 = vmatpush3.bf16.msra.mxu0 %v2121_v49  ;;  %v2139_v49 = vld [vmem:[#allocation20 + $0x38] sm:$0xff]  }
 0x263   :  { %1887 = vmatpush3.bf16.msra.mxu1 %v2100_v53  ;;  %1938 = vmatprep.subr.bf16.mxu0 %v2122_v50 }
 0x264   :  { %1888 = vmatprep.subr.bf16.mxu1 %v2101_v54 }
 0x266   :  { %1939 = vmatpush3.bf16.msra.mxu0 %v2122_v50 }
 0x267   :  { %1889 = vmatpush3.bf16.msra.mxu1 %v2101_v54  ;;  %1952 = vmatprep.subr.bf16.mxu0 %v2630_v51 }
 0x268   :  { %1890 = vmatprep.subr.bf16.mxu1 %v2102_v55 }
 0x26b   :  { %1891 = vmatpush3.bf16.msra.mxu1 %v2102_v55 }
 0x26c   :  { %1892 = vmatprep.subr.bf16.mxu1 %v2103_v56 }
 0x26f   :  { %1893 = vmatpush3.bf16.msra.mxu1 %v2103_v56 }
 0x270   :  { %1894 = vmatprep.subr.bf16.mxu1 %v2104_v57 }
 0x273   :  { %1895 = vmatpush3.bf16.msra.mxu1 %v2104_v57 }
 0x274   :  { %1896 = vmatprep.subr.bf16.mxu1 %v2105_v58 }
 0x277   :  { %1897 = vmatpush3.bf16.msra.mxu1 %v2105_v58 }
 0x278   :  { %1898 = vmatprep.subr.bf16.mxu1 %v2106_v59 }
 0x27b   :  { %1899 = vmatpush3.bf16.msra.mxu1 %v2106_v59 }
 0x27c   :  { %1904 = vmatprep.subr.bf16.mxu1 %v2107_v60 }
 0x27e   :  { %1901 = vmatmul.mubr.bf16.vlgmr.msra.gmra.mrb[4].mxu1 %v2970_v15  ;;  %v2114_v15 = vld [vmem:[#allocation13 + $0x38] sm:$0xff]  }
 0x27f   :  { %1905 = vmatpush3.bf16.msra.mxu1 %v2107_v60 }
 0x280   :  { %1906 = vmatprep.subr.bf16.mxu1 %v2108_v61 }
 0x283   :  { %1907 = vmatpush3.bf16.msra.mxu1 %v2108_v61 }
 0x284   :  { %1908 = vmatprep.subr.bf16.mxu1 %v2109_v62 }
 0x287   :  { %1909 = vmatpush3.bf16.msra.mxu1 %v2109_v62 }
 0x288   :  { %1910 = vmatprep.subr.bf16.mxu1 %v2110_v63 }
 0x28b   :  { %1911 = vmatpush3.bf16.msra.mxu1 %v2110_v63 }
 0x28c   :  { %1912 = vmatprep.subr.bf16.mxu1 %v2111_v0 }
 0x28f   :  { %1913 = vmatpush3.bf16.msra.mxu1 %v2111_v0 }
 0x290   :  { %1914 = vmatprep.subr.bf16.mxu1 %v2112_v1 }
 0x293   :  { %1915 = vmatpush3.bf16.msra.mxu1 %v2112_v1 }
 0x294   :  { %1916 = vmatprep.subr.bf16.mxu1 %v2113_v12 }
 0x297   :  { %1917 = vmatpush3.bf16.msra.mxu1 %v2113_v12  ;;  %v2129_v12 = vld [vmem:[#allocation22 + $0x30] sm:$0xff]  }
 0x298   :  { %1918 = vmatprep.subr.bf16.mxu1 %v2114_v15 }
 0x29b   :  { %1919 = vmatpush3.bf16.msra.mxu1 %v2114_v15 }
 0x29c   :  { %1944 = vmatprep.subr.bf16.mxu1 %v2630_v51 }
 0x331   :  { %v1882_v2 = vpop.f32.mrb[0].mxu1 }
 0x332   :  { %v547_v3 = vmax.f32 %v1882_v2, 1.0  ;;  %v530_v4 = vpop.f32.mrb[1].mxu1 }
 0x333   :  { %v545_v5 = vmax.f32 %v530_v4, 1.0  ;;  %v1883_v6 = vpop.f32.mrb[2].mxu1 }
 0x334   :  { %2164 = vrcp.f32 %v547_v3  ;;  %v548_v7 = vmax.f32 %v1883_v6, 1.0  ;;  %v533_v8 = vpop.f32.mrb[3].mxu1 }
 0x335   :  { %2166 = vrcp.f32 %v545_v5  ;;  %v546_v9 = vmax.f32 %v533_v8, 1.0  ;;  %v2123_v5 = vld [vmem:[#allocation22] sm:$0xff]  }
 0x336   :  { %2168 = vrcp.f32 %v548_v7  ;;  %v2124_v7 = vld [vmem:[#allocation22 + $0x8] sm:$0xff]  }
 0x337   :  { %2170 = vrcp.f32 %v546_v9  ;;  %v2126_v9 = vld [vmem:[#allocation22 + $0x18] sm:$0xff]  }
 0x33e   :  { %v2165_v10 = vpop.eup %2164 }
 0x33f   :  { %v2167_v11 = vpop.eup %2166  ;;  %565 = vperm.xlu1 %2088, %v2165_v10   ;;  %v2127_v10 = vld [vmem:[#allocation22 + $0x20] sm:$0xff]  }
 0x340   :  { %555 = vperm.xlu0 %2087, %v2167_v11   ;;  %v2169_v13 = vpop.eup %2168  ;;  %v2128_v11 = vld [vmem:[#allocation22 + $0x28] sm:$0xff]  }
 0x341   :  { %v2171_v14 = vpop.eup %2170 }
 0x343   :  { %570 = vperm.xlu1 %2088, %v2169_v13   ;;  %v2130_v13 = vld [vmem:[#allocation22 + $0x38] sm:$0xff]  }
 0x344   :  { %560 = vperm.xlu0 %2087, %v2171_v14   ;;  %v1695_v14 = vld [vmem:[#allocation19] ss:$0 sm:$0xff] }
 0x3be   :  { %v566_v16 = vpop.permute.xlu1 %565 }
 0x3bf   :  { %v556_v17 = vpop.permute.xlu0 %555  ;;  %v575_v19 = vmul.f32 %v1882_v2, %v566_v16 }
 0x3c0   :  { %v573_v22 = vmul.f32 %v556_v17, %v530_v4 }
 0x3c2   :  { %v571_v18 = vpop.permute.xlu1 %570 }
 0x3c3   :  { %v576_v20 = vmul.f32 %v1883_v6, %v571_v18  ;;  %v561_v21 = vpop.permute.xlu0 %560 }
 0x3c4   :  { %v574_v23 = vmul.f32 %v561_v21, %v533_v8  ;;  %v2125_v8 = vld [vmem:[#allocation22 + $0x10] sm:$0xff]  }
 0x3c5   :  { %v578_v24 = vpack.c.bf16 %v576_v20, %v575_v19 }
 0x3c6   :  { %v577_v25 = vpack.c.bf16 %v574_v23, %v573_v22 }
 0x3c8   :  { %1920 = vmatprep.mubr.bf16.mxu1 %v577_v25 }
 0x3c9   :  { %1921 = vmatmul.mubr.bf16.vlgmr.msra.gmra.mrb[4].mxu1 %v578_v24 }
 0x3ca   :  { %1948 = vmatprep.mubr.msk.bf16.mxu1 %vm2631_vm1, %v2630_v51 }
 0x49c   :  { %v1922_v30 = vpop.f32.mrb[4].mxu1 }
 0x49d   :  { %v758_v31 = vpop.f32.mrb[5].mxu1  ;;  %v781_v32 = vadd.f32 %v1922_v30, %v1694_v29 }
 0x49e   :  { %v779_v33 = vadd.f32 %v1694_v29, %v758_v31  ;;  %v1923_v34 = vpop.f32.mrb[6].mxu1 }
 0x49f   :  { %v761_v35 = vpop.f32.mrb[7].mxu1  ;;  %v785_v38 = vmax.f32 %v781_v32, 0.0  ;;  %v782_v39 = vadd.f32 %v1923_v34, %v1694_v29  ;;  %v2132_v34 = vld [vmem:[#allocation20] sm:$0xff]  }
 0x4a0   :  { %v783_v36 = vmax.f32 %v779_v33, 0.0  ;;  %v780_v37 = vadd.f32 %v1694_v29, %v761_v35  ;;  %v2131_v29 = vld [vmem:[#allocation7] sm:$0xff]  }
 0x4a1   :  { %v786_v43 = vmax.f32 %v782_v39, 0.0  ;;  %v789_v44 = vmul.f32 %v785_v38, %v785_v38  ;;  %v2133_v35 = vld [vmem:[#allocation20 + $0x8] sm:$0xff]  }
 0x4a2   :  { %v784_v40 = vmax.f32 %v780_v37, 0.0  ;;  %v787_v41 = vmul.f32 %v783_v36, %v783_v36  ;;  %v2135_v37 = vld [vmem:[#allocation20 + $0x18] sm:$0xff]   ;;  %v2137_v39 = vld [vmem:[#allocation20 + $0x28] sm:$0xff]  }
 0x4a3   :  { %v790_v45 = vmul.f32 %v786_v43, %v786_v43 }
 0x4a4   :  { %791 = vadd.xlane.f32.xlu0 %v787_v41  ;;  %v788_v42 = vmul.f32 %v784_v40, %v784_v40 }
 0x4a6   :  { %793 = vadd.xlane.f32.xlu1 %v788_v42 }
 0x4a8   :  { %795 = vadd.xlane.f32.xlu0 %v789_v44 }
 0x4ac   :  { %797 = vadd.xlane.f32.xlu0 %v790_v45 }
 0x531   :  { %v792_v52 = vpop.xlane.xlu0 %791 }
 0x532   :  { %2172 = vrsqrt.f32 %v792_v52  ;;  %vm799_vm2 = vcmp.eq.f32.partialorder %v792_v52, 0.0 }
 0x533   :  { %v794_v53 = vpop.xlane.xlu1 %793 }
 0x534   :  { %2174 = vrsqrt.f32 %v794_v53  ;;  %vm800_vm3 = vcmp.eq.f32.partialorder %v794_v53, 0.0 }
 0x535   :  { %v796_v54 = vpop.xlane.xlu0 %795 }
 0x536   :  { %2176 = vrsqrt.f32 %v796_v54  ;;  %vm801_vm4 = vcmp.eq.f32.partialorder %v796_v54, 0.0 }
 0x539   :  { %v798_v55 = vpop.xlane.xlu0 %797 }
 0x53a   :  { %2178 = vrsqrt.f32 %v798_v55  ;;  %vm802_vm5 = vcmp.eq.f32.partialorder %v798_v55, 0.0 }
 0x53c   :  { %v2173_v56 = vpop.eup %2172 }
 0x53d   :  { %v807_v57 = vsel %vm799_vm2, 1.0, %v2173_v56  ;;  %v2140_v56 = vld [vmem:[#allocation25] sm:$0xff]  }
 0x53e   :  { %v2175_v58 = vpop.eup %2174  ;;  %v811_v61 = vmul.f32 %v807_v57, %v783_v36  ;;  %v2134_v36 = vld [vmem:[#allocation20 + $0x10] sm:$0xff]  }
 0x53f   :  { %v808_v59 = vsel %vm800_vm3, 1.0, %v2175_v58  ;;  %v2141_v57 = vld [vmem:[#allocation25 + $0x8] sm:$0xff]   ;;  %v2142_v58 = vld [vmem:[#allocation25 + $0x10] sm:$0xff]  }
 0x540   :  { %v2177_v60 = vpop.eup %2176  ;;  %v812_v62 = vmul.f32 %v808_v59, %v784_v40  ;;  %v2138_v40 = vld [vmem:[#allocation20 + $0x30] sm:$0xff]   ;;  %v2143_v59 = vld [vmem:[#allocation25 + $0x18] sm:$0xff]  }
 0x541   :  { %v809_v0 = vsel %vm801_vm4, 1.0, %v2177_v60  ;;  %v1722_v60 = vld [vmem:[#allocation23] ss:$0 sm:$0xff] }
 0x542   :  { %v867_v63 = vpack.c.bf16 %v812_v62, %v811_v61  ;;  %v813_v3 = vmul.f32 %v809_v0, %v785_v38  ;;  %v2136_v38 = vld [vmem:[#allocation20 + $0x20] sm:$0xff]  }
 0x544   :  { %v2179_v1 = vpop.eup %2178  ;;  %1940 = vmatprep.mubr.bf16.mxu0 %v867_v63 }
 0x545   :  { %v810_v2 = vsel %vm802_vm5, 1.0, %v2179_v1 }
 0x546   :  { %v814_v4 = vmul.f32 %v810_v2, %v786_v43 }
 0x548   :  { %v868_v6 = vpack.c.bf16 %v814_v4, %v813_v3 }
 0x54a   :  { %1941 = vmatmul.mubr.bf16.vlgmr.msra.gmra.mrb[8].mxu0 %v868_v6 }
 0x54b   :  { %1953 = vmatpush3.bf16.msra.mxu0 %v2123_v5  ;;  %1968 = vmatprep.mubr.msk.bf16.mxu0 %vm2631_vm1, %v2630_v51 }
 0x54c   :  { %1954 = vmatprep.subr.bf16.mxu0 %v2630_v51 }
 0x54f   :  { %1955 = vmatpush3.bf16.msra.mxu0 %v2124_v7 }
 0x550   :  { %1956 = vmatprep.subr.bf16.mxu0 %v2630_v51 }
 0x553   :  { %1957 = vmatpush3.bf16.msra.mxu0 %v2125_v8 }
 0x554   :  { %1958 = vmatprep.subr.bf16.mxu0 %v2630_v51 }
 0x557   :  { %1959 = vmatpush3.bf16.msra.mxu0 %v2126_v9  ;;  %v2144_v9 = vld [vmem:[#allocation25 + $0x20] sm:$0xff]  }
 0x558   :  { %1960 = vmatprep.subr.bf16.mxu0 %v2630_v51 }
 0x55b   :  { %1961 = vmatpush3.bf16.msra.mxu0 %v2127_v10  ;;  %v2145_v10 = vld [vmem:[#allocation25 + $0x28] sm:$0xff]  }
 0x55c   :  { %1962 = vmatprep.subr.bf16.mxu0 %v2630_v51 }
 0x55f   :  { %1963 = vmatpush3.bf16.msra.mxu0 %v2128_v11  ;;  %v2146_v11 = vld [vmem:[#allocation25 + $0x30] sm:$0xff]  }
 0x560   :  { %1964 = vmatprep.subr.bf16.mxu0 %v2630_v51 }
 0x563   :  { %1965 = vmatpush3.bf16.msra.mxu0 %v2129_v12  ;;  %v2147_v12 = vld [vmem:[#allocation25 + $0x38] sm:$0xff]  }
 0x564   :  { %1966 = vmatprep.subr.bf16.mxu0 %v2630_v51 }
 0x567   :  { %1967 = vmatpush3.bf16.msra.mxu0 %v2130_v13 }
 0x568   :  { %1992 = vmatprep.subr.bf16.mxu0 %v2630_v51 }
 0x56a   :  { %1969 = vmatmul.mubr.bf16.vlgmr.msra.gmra.mrb[12].mxu0 %v867_v63 }
 0x56b   :  { %2008 = vmatprep.mubr.msk.bf16.mxu0 %vm2631_vm1, %v2630_v51  ;;  %1993 = vmatpush3.bf16.msra.mxu0 %v2140_v56 }
 0x56c   :  { %1994 = vmatprep.subr.bf16.mxu0 %v2630_v51 }
 0x56f   :  { %1995 = vmatpush3.bf16.msra.mxu0 %v2141_v57 }
 0x570   :  { %1996 = vmatprep.subr.bf16.mxu0 %v2630_v51 }
 0x573   :  { %1997 = vmatpush3.bf16.msra.mxu0 %v2142_v58 }
 0x574   :  { %1998 = vmatprep.subr.bf16.mxu0 %v2630_v51 }
 0x577   :  { %1999 = vmatpush3.bf16.msra.mxu0 %v2143_v59 }
 0x578   :  { %2000 = vmatprep.subr.bf16.mxu0 %v2630_v51 }
 0x57b   :  { %2001 = vmatpush3.bf16.msra.mxu0 %v2144_v9 }
 0x57c   :  { %2002 = vmatprep.subr.bf16.mxu0 %v2630_v51 }
 0x57f   :  { %2003 = vmatpush3.bf16.msra.mxu0 %v2145_v10 }
 0x580   :  { %2004 = vmatprep.subr.bf16.mxu0 %v2630_v51 }
 0x583   :  { %2005 = vmatpush3.bf16.msra.mxu0 %v2146_v11 }
 0x584   :  { %2006 = vmatprep.subr.bf16.mxu0 %v2630_v51 }
 0x587   :  { %2007 = vmatpush3.bf16.msra.mxu0 %v2147_v12 }
 0x588   :  { %2038 = vmatprep.subr.bf16.mxu0 %v2630_v51 }
 0x61d   :  { %v1942_v15 = vpop.f32.mrb[8].mxu0 }
 0x61e   :  { %v966_v16 = vadd.f32 %v1942_v15, %v1695_v14  ;;  %v957_v17 = vpop.f32.mrb[9].mxu0 }
 0x61f   :  { %v958_v18 = vadd.f32 %v1695_v14, %v957_v17  ;;  %v1943_v19 = vpop.f32.mrb[10].mxu0 }
 0x620   :  { %v969_v20 = vadd.f32 %v1943_v19, %v1695_v14  ;;  %v960_v21 = vpop.f32.mrb[11].mxu0  ;;  %v974_v23 = vmax.f32 %v966_v16, 0.0 }
 0x621   :  { %v961_v22 = vadd.f32 %v1695_v14, %v960_v21  ;;  %v972_v25 = vmax.f32 %v958_v18, 0.0 }
 0x622   :  { %v975_v24 = vmax.f32 %v969_v20, 0.0 }
 0x623   :  { %v973_v26 = vmax.f32 %v961_v22, 0.0  ;;  %v1723_v22 = vld [vmem:[#allocation26] ss:$0 sm:$0xff] }
 0x624   :  { %v977_v27 = vpack.c.bf16 %v975_v24, %v974_v23 }
 0x625   :  { %v976_v28 = vpack.c.bf16 %v973_v26, %v972_v25 }
 0x627   :  { %1945 = vmatpush3.bf16.msra.mxu1 %v976_v28 }
 0x628   :  { %1946 = vmatprep.subr.bf16.mxu1 %v2630_v51 }
 0x62b   :  { %1947 = vmatpush3.bf16.msra.mxu1 %v977_v27 }
 0x62c   :  { %1972 = vmatprep.subr.bf16.mxu1 %v2630_v51 }
 0x62e   :  { %1949 = vmatmul.mubr.msk.bf16.vlgmr.msra.gmra.mrb[8].mxu1 %vm983_vm6, %v2131_v29 }
 0x62f   :  { %1988 = vmatprep.mubr.msk.bf16.mxu1 %vm2631_vm1, %v2630_v51  ;;  %1973 = vmatpush3.bf16.msra.mxu1 %v2132_v34  ;;  %v2149_v34 = vld [vmem:[%s3113_s27 + $0x8] sm:$0xff]  }
 0x630   :  { %1974 = vmatprep.subr.bf16.mxu1 %v2630_v51 }
 0x633   :  { %1975 = vmatpush3.bf16.msra.mxu1 %v2133_v35  ;;  %v2150_v35 = vld [vmem:[%s3113_s27 + $0x10] sm:$0xff]  }
 0x634   :  { %1976 = vmatprep.subr.bf16.mxu1 %v2630_v51 }
 0x637   :  { %1977 = vmatpush3.bf16.msra.mxu1 %v2134_v36  ;;  %v2151_v36 = vld [vmem:[%s3113_s27 + $0x18] sm:$0xff]  }
 0x638   :  { %1978 = vmatprep.subr.bf16.mxu1 %v2630_v51 }
 0x63b   :  { %1979 = vmatpush3.bf16.msra.mxu1 %v2135_v37  ;;  %v2152_v37 = vld [vmem:[%s3113_s27 + $0x20] sm:$0xff]  }
 0x63c   :  { %1980 = vmatprep.subr.bf16.mxu1 %v2630_v51 }
 0x63d   :  { %v1127_v30 = vpop.f32.mrb[12].mxu0 }
 0x63e   :  { %v1970_v31 = vpop.f32.mrb[13].mxu0 }
 0x63f   :  { %v2997_v32 = vpop.f32.mrb[14].mxu0  ;;  %1981 = vmatpush3.bf16.msra.mxu1 %v2136_v38  ;;  %v2153_v38 = vld [vmem:[%s3113_s27 + $0x28] sm:$0xff]  }
 0x640   :  { %v1971_v33 = vpop.f32.mrb[15].mxu0  ;;  %1982 = vmatprep.subr.bf16.mxu1 %v2630_v51 }
 0x641   :  { %v2148_v33 = vld [vmem:[%s3113_s27] sm:$0xff]  }
 0x643   :  { %1983 = vmatpush3.bf16.msra.mxu1 %v2137_v39  ;;  %v2154_v39 = vld [vmem:[%s3113_s27 + $0x30] sm:$0xff]  }
 0x644   :  { %1984 = vmatprep.subr.bf16.mxu1 %v2630_v51 }
 0x647   :  { %1985 = vmatpush3.bf16.msra.mxu1 %v2138_v40  ;;  %v2155_v40 = vld [vmem:[%s3113_s27 + $0x38] sm:$0xff]  }
 0x648   :  { %1986 = vmatprep.subr.bf16.mxu1 %v2630_v51 }
 0x64b   :  { %1987 = vmatpush3.bf16.msra.mxu1 %v2139_v49 }
 0x64c   :  { %2012 = vmatprep.subr.bf16.mxu1 %v2630_v51 }
 0x701   :  { %v1021_v41 = vpop.f32.mrb[8].mxu1 }
 0x702   :  { %v1028_v42 = vmax.f32 %v1021_v41, 1.0  ;;  %v1950_v43 = vpop.f32.mrb[9].mxu1 }
 0x703   :  { %v1024_v44 = vpop.f32.mrb[10].mxu1  ;;  %v2158_v43 = vld [vmem:[#allocation28 + $0x10] sm:$0xff]  }
 0x704   :  { %2180 = vrcp.f32 %v1028_v42  ;;  %v1029_v45 = vmax.f32 %v1024_v44, 1.0  ;;  %v1951_v46 = vpop.f32.mrb[11].mxu1  ;;  %v2157_v42 = vld [vmem:[#allocation28 + $0x8] sm:$0xff]  }
 0x705   :  { %v2161_v46 = vld [vmem:[#allocation28 + $0x28] sm:$0xff]  }
 0x706   :  { %2182 = vrcp.f32 %v1029_v45  ;;  %v2160_v45 = vld [vmem:[#allocation28 + $0x20] sm:$0xff]  }
 0x70e   :  { %v2181_v47 = vpop.eup %2180 }
 0x70f   :  { %1034 = vperm.xlu1 %2088, %v2181_v47   ;;  %v2162_v47 = vld [vmem:[#allocation28 + $0x30] sm:$0xff]  }
 0x710   :  { %v2183_v48 = vpop.eup %2182 }
 0x711   :  { %1039 = vperm.xlu0 %2087, %v2183_v48  }
 0x78e   :  { %v1035_v50 = vpop.permute.xlu1 %1034 }
 0x78f   :  { %v1042_v53 = vmul.f32 %v1035_v50, %v1021_v41  ;;  %v2156_v41 = vld [vmem:[#allocation28] sm:$0xff]  }
 0x790   :  { %v1040_v52 = vpop.permute.xlu0 %1039 }
 0x791   :  { %v1043_v54 = vmul.f32 %v1040_v52, %v1024_v44  ;;  %v2159_v44 = vld [vmem:[#allocation28 + $0x18] sm:$0xff]  }
 0x793   :  { %v1044_v55 = vpack.c.bf16 %v1043_v54, %v1042_v53 }
 0x795   :  { %1989 = vmatmul.mubr.bf16.vlgmr.msra.gmra.mrb[12].mxu1 %v1044_v55  ;;  %v2163_v55 = vld [vmem:[#allocation28 + $0x38] sm:$0xff]  }
 0x796   :  { %2014 = vmatprep.mubr.msk.bf16.mxu1 %vm2631_vm1, %v2630_v51 }
 0x868   :  { %v1216_v61 = vpop.f32.mrb[12].mxu1 }
 0x869   :  { %v1217_v62 = vadd.f32 %v1216_v61, %v1127_v30  ;;  %v1990_v63 = vpop.f32.mrb[13].mxu1 }
 0x86a   :  { %v1219_v0 = vpop.f32.mrb[14].mxu1 }
 0x86b   :  { %v1229_v1 = vadd.f32 %v1722_v60, %v1217_v62  ;;  %v1220_v2 = vadd.f32 %v1219_v0, %v2997_v32  ;;  %v1991_v3 = vpop.f32.mrb[15].mxu1  ;;  %v1297_v32 = vld [vmem:[#allocation8] sm:$0xf] }
 0x86d   :  { %v1231_v4 = vmax.f32 %v1229_v1, 0.0  ;;  %v1230_v5 = vadd.f32 %v1722_v60, %v1220_v2 }
 0x86f   :  { %v1232_v6 = vmax.f32 %v1230_v5, 0.0  ;;  %v1233_v7 = vmul.f32 %v1231_v4, %v1231_v4 }
 0x871   :  { %1235 = vadd.xlane.f32.xlu1 %v1233_v7  ;;  %v1234_v8 = vmul.f32 %v1232_v6, %v1232_v6 }
 0x873   :  { %1237 = vadd.xlane.f32.xlu0 %v1234_v8 }
 0x8fe   :  { %v1236_v13 = vpop.xlane.xlu1 %1235 }
 0x8ff   :  { %2184 = vrsqrt.f32 %v1236_v13  ;;  %vm1239_vm7 = vcmp.eq.f32.partialorder %v1236_v13, 0.0 }
 0x900   :  { %v1238_v14 = vpop.xlane.xlu0 %1237 }
 0x901   :  { %2186 = vrsqrt.f32 %v1238_v14  ;;  %vm1240_vm8 = vcmp.eq.f32.partialorder %v1238_v14, 0.0 }
 0x909   :  { %v2185_v15 = vpop.eup %2184 }
 0x90a   :  { %v1243_v16 = vsel %vm1239_vm7, 1.0, %v2185_v15 }
 0x90b   :  { %v2187_v17 = vpop.eup %2186  ;;  %v1245_v19 = vmul.f32 %v1243_v16, %v1231_v4 }
 0x90c   :  { %v1244_v18 = vsel %vm1240_vm8, 1.0, %v2187_v17 }
 0x90d   :  { %v1246_v20 = vmul.f32 %v1244_v18, %v1232_v6 }
 0x90f   :  { %v1298_v21 = vpack.c.bf16 %v1246_v20, %v1245_v19 }
 0x911   :  { %2009 = vmatmul.mubr.bf16.vlgmr.msra.gmra.mrb[16].mxu0 %v1298_v21 }
 0x912   :  { %2054 = vmatprep.mubr.msk.bf16.mxu0 %vm2631_vm1, %v2630_v51  ;;  %2039 = vmatpush3.bf16.msra.mxu0 %v2156_v41 }
 0x913   :  { %2040 = vmatprep.subr.bf16.mxu0 %v2630_v51 }
 0x916   :  { %2041 = vmatpush3.bf16.msra.mxu0 %v2157_v42 }
 0x917   :  { %2042 = vmatprep.subr.bf16.mxu0 %v2630_v51 }
 0x91a   :  { %2043 = vmatpush3.bf16.msra.mxu0 %v2158_v43 }
 0x91b   :  { %2044 = vmatprep.subr.bf16.mxu0 %v2630_v51 }
 0x91e   :  { %2045 = vmatpush3.bf16.msra.mxu0 %v2159_v44 }
 0x91f   :  { %2046 = vmatprep.subr.bf16.mxu0 %v2630_v51 }
 0x922   :  { %2047 = vmatpush3.bf16.msra.mxu0 %v2160_v45 }
 0x923   :  { %2048 = vmatprep.subr.bf16.mxu0 %v2630_v51 }
 0x926   :  { %2049 = vmatpush3.bf16.msra.mxu0 %v2161_v46 }
 0x927   :  { %2050 = vmatprep.subr.bf16.mxu0 %v2630_v51 }
 0x92a   :  { %2051 = vmatpush3.bf16.msra.mxu0 %v2162_v47 }
 0x92b   :  { %2052 = vmatprep.subr.bf16.mxu0 %v2630_v51 }
 0x92e   :  { %2053 = vmatpush3.bf16.msra.mxu0 %v2163_v55 }
 0x9e4   :  { %v1387_v23 = vpop.f32.mrb[16].mxu0 }
 0x9e5   :  { %v1388_v24 = vadd.f32 %v1723_v22, %v1387_v23  ;;  %v2010_v25 = vpop.f32.mrb[17].mxu0 }
 0x9e6   :  { %v1390_v26 = vpop.f32.mrb[18].mxu0 }
 0x9e7   :  { %v1391_v27 = vadd.f32 %v1723_v22, %v1390_v26  ;;  %v2011_v28 = vpop.f32.mrb[19].mxu0  ;;  %v1394_v29 = vmax.f32 %v1388_v24, 0.0 }
 0x9e9   :  { %v1395_v30 = vmax.f32 %v1391_v27, 0.0 }
 0x9eb   :  { %v1396_v31 = vpack.c.bf16 %v1395_v30, %v1394_v29 }
 0x9ed   :  { %2013 = vmatpush3.bf16.msra.mxu1 %v1396_v31 }
 0x9ee   :  { %2018 = vmatprep.subr.bf16.mxu1 %v2630_v51 }
 0x9f0   :  { %2015 = vmatmul.mubr.msk.bf16.vlgmr.msra.gmra.mrb[16].mxu1 %vm1397_vm9, %v1297_v32 }
 0x9f1   :  { %2019 = vmatpush3.bf16.msra.mxu1 %v2148_v33  ;;  %2034 = vmatprep.mubr.msk.bf16.mxu1 %vm2631_vm1, %v2630_v51 }
 0x9f2   :  { %2020 = vmatprep.subr.bf16.mxu1 %v2630_v51 }
 0x9f5   :  { %2021 = vmatpush3.bf16.msra.mxu1 %v2149_v34 }
 0x9f6   :  { %2022 = vmatprep.subr.bf16.mxu1 %v2630_v51 }
 0x9f9   :  { %2023 = vmatpush3.bf16.msra.mxu1 %v2150_v35 }
 0x9fa   :  { %2024 = vmatprep.subr.bf16.mxu1 %v2630_v51 }
 0x9fd   :  { %2025 = vmatpush3.bf16.msra.mxu1 %v2151_v36 }
 0x9fe   :  { %2026 = vmatprep.subr.bf16.mxu1 %v2630_v51 }
 0xa01   :  { %2027 = vmatpush3.bf16.msra.mxu1 %v2152_v37 }
 0xa02   :  { %2028 = vmatprep.subr.bf16.mxu1 %v2630_v51 }
 0xa05   :  { %2029 = vmatpush3.bf16.msra.mxu1 %v2153_v38 }
 0xa06   :  { %2030 = vmatprep.subr.bf16.mxu1 %v2630_v51 }
 0xa09   :  { %2031 = vmatpush3.bf16.msra.mxu1 %v2154_v39 }
 0xa0a   :  { %2032 = vmatprep.subr.bf16.mxu1 %v2630_v51  ;;  %v1749_v51 = vld [vmem:[%s3114_s21] ss:$0 sm:$0xff] }
 0xa0d   :  { %2033 = vmatpush3.bf16.msra.mxu1 %v2155_v40 }
 0xa10   :  { %2035 = vmatmul.mubr.bf16.vlgmr.msra.gmra.mrb[20].mxu1 %v1298_v21 }
 0xac3   :  { %v1435_v48 = vpop.f32.mrb[16].mxu1 }
 0xac4   :  { %v1441_v49 = vmax.f32 %v1435_v48, 1.0  ;;  %v2016_v50 = vpop.f32.mrb[17].mxu1 }
 0xac5   :  { %v1438_v52 = vpop.f32.mrb[18].mxu1 }
 0xac6   :  { %2188 = vrcp.f32 %v1441_v49  ;;  %v2017_v53 = vpop.f32.mrb[19].mxu1 }
 0xad0   :  { %v2189_v54 = vpop.eup %2188 }
 0xad1   :  { %1445 = vperm.xlu1 %2088, %v2189_v54  }
 0xae3   :  { %v1532_v56 = vpop.f32.mrb[20].mxu1 }
 0xae4   :  { %v2036_v57 = vpop.f32.mrb[21].mxu1 }
 0xae5   :  { %v1535_v58 = vpop.f32.mrb[22].mxu1 }
 0xae6   :  { %v2037_v59 = vpop.f32.mrb[23].mxu1 }
 0xb50   :  { %v1446_v60 = vpop.permute.xlu1 %1445 }
 0xb51   :  { %v1448_v61 = vmul.f32 %v1446_v60, %v1435_v48 }
 0xb53   :  { %v1449_v62 = vpack.c.bf16 %v1448_v61, %v1448_v61 }
 0xb55   :  { %2055 = vmatmul.mubr.bf16.vlgmr.msra.gmra.mrb[20].mxu0 %v1449_v62 }
 0xc28   :  { %v1620_v63 = vpop.f32.mrb[20].mxu0 }
 0xc29   :  { %v1621_v0 = vadd.f32 %v1620_v63, %v1532_v56  ;;  %v2056_v1 = vpop.f32.mrb[21].mxu0 }
 0xc2a   :  { %v1623_v2 = vpop.f32.mrb[22].mxu0 }
 0xc2b   :  { %v1632_v3 = vadd.f32 %v1749_v51, %v1621_v0  ;;  %v2057_v4 = vpop.f32.mrb[23].mxu0 }
 0xc2d   :  { %v1633_v5 = vmax.f32 %v1632_v3, 0.0 }
 0xc2f   :  { %v1634_v6 = vmul.f32 %v1633_v5, %v1633_v5 }
 0xc31   :  { %1635 = vadd.xlane.f32.xlu0 %v1634_v6 }
 0xcbe   :  { %v1636_v7 = vpop.xlane.xlu0 %1635 }
 0xcbf   :  { %2190 = vrsqrt.f32 %v1636_v7  ;;  %vm1637_vm10 = vcmp.eq.f32.partialorder %v1636_v7, 0.0 }
 0xcc9   :  { %v2191_v8 = vpop.eup %2190 }
 0xcca   :  { %v1639_v9 = vsel %vm1637_vm10, 1.0, %v2191_v8 }
 0xccb   :  { %v1640_v10 = vmul.f32 %v1639_v9, %v1633_v5 }
 0xccd   :  { %1641 = vst [vmem:[#allocation29] sm:$0xff] %v1640_v10 }
 0xcce   :  { %2577 = shalt.err (!%p2574_p0)
}
 0xccf   :  { %s3115_s15 = sld [smem:[#allocation46_spill]] }
 0xcd5   :  { %s2578_s25 = scalar_lea.hbm %s3115_s15, 128 }
 0xcd6   :  { %p2579_p1 = scmp.ne.s32.totalorder %s3115_s15, %s2578_s25  ;;  %p2582_p2 = scmp.lt.u32.totalorder %s2578_s25, %s3115_s15 }
 0xcd8   :  { %p2584_p3 = pnand %p2582_p2, %p2579_p1 }
 0xcda   :  { %2587 = shalt.err (!%p2584_p3)
}
 0xcdb   :  { %1651 = dma.vmem_to_hbm [thread:$0]  %s1649_s30, 128, %s3115_s15, [#allocation4]  }
 0xcdc   :  { %2606 = dma.done.wait [#allocation4], 128  }
 0xcdd   :  { %2607 = vsyncadd [#allocation4], 4294967168 }
 0xcde   :  { %1655 = vsyncpa [#allocation3], 1 }
 0xcdf   :  { %1656 = vsyncpa [#allocation6], 1 }
 0xce0   :  { %1657 = vsyncpa [#allocation9], 1 }
 0xce1   :  { %1658 = vsyncpa [#allocation12], 1 }
 0xce2   :  { %1659 = vsyncpa [#allocation15], 1 }
 0xce3   :  { %1660 = vsyncpa [#allocation18], 1 }
 0xce4   :  { %1661 = vsyncpa [#allocation21], 1 }
 0xce5   :  { %1662 = vsyncpa [#allocation24], 1 }
 0xce6   :  { %1663 = vsyncpa [#allocation27], 1 }
 0xce7   :  { %1664 = vsyncpa [#allocation4], 1 }

</bundles_post_ra>
